<compile_context>
chip_gen: v7x
topology: tpu7x:2x2x1
jax: 0.10.0
libtpu: 0.0.40
codegen_flags: <defaults>
</compile_context>

<pallas_src>
import functools
import math

import jax
import jax.numpy as jnp
from jax.experimental import pallas as pl
from jax.experimental.pallas import tpu as pltpu


# ----------------------------------------------------------------------------
# In-kernel math helpers
# ----------------------------------------------------------------------------
def _layer_norm(x, gamma, beta, eps):
    mu = jnp.mean(x, axis=-1, keepdims=True)
    xc = x - mu
    var = jnp.mean(xc * xc, axis=-1, keepdims=True)
    inv = jax.lax.rsqrt(var + eps)
    return xc * inv * gamma + beta


def _encoder_layer_math(x, wqkv, bqkv, wo, bo, g1, b1, w1, bf1, w2, bf2, g2, b2,
                        *, nhead, eps):
    """One post-norm TransformerEncoderLayer (ReLU FFN, eval mode) on a (T, D) slab.

    bf16 MXU operands, f32 accumulation; norms/softmax/residuals in f32.
    """
    T, D = x.shape
    hd = D // nhead
    scale = 1.0 / math.sqrt(hd)

    x_bf = x.astype(jnp.bfloat16)

    # Single fused input projection for Q, K, V (one MXU matmul, K=D, N=3D).
    qkv = jnp.dot(x_bf, wqkv, preferred_element_type=jnp.float32) + bqkv    # (T, 3D)

    # D-aligned Q / K / V slabs (lane-aligned when D is a multiple of 128);
    # Q pre-scaled so the (T, T) score matrices are not scaled per head.
    q = (qkv[:, :D] * scale).astype(jnp.bfloat16)
    k = qkv[:, D:2 * D].astype(jnp.bfloat16)
    v = qkv[:, 2 * D:].astype(jnp.bfloat16)

    # Per-head attention; heads are gathered into one (T, D) context slab so the
    # output projection is a single K=D matmul (no nhead K=hd matmuls).
    ctx_parts = []
    for h in range(nhead):
        lo = h * hd
        qh = q[:, lo:lo + hd]
        kh = k[:, lo:lo + hd]
        vh = v[:, lo:lo + hd]
        s = jax.lax.dot_general(qh, kh, (((1,), (1,)), ((), ())),
                                preferred_element_type=jnp.float32)         # (T, T)
        s = s - jnp.max(s, axis=-1, keepdims=True)
        p = jnp.exp(s)
        inv = pl.reciprocal(jnp.sum(p, axis=-1, keepdims=True), approx=True)
        ctx_h = jnp.dot(p.astype(jnp.bfloat16), vh,
                        preferred_element_type=jnp.float32) * inv           # (T, hd)
        ctx_parts.append(ctx_h)
    ctx = jnp.concatenate(ctx_parts, axis=-1).astype(jnp.bfloat16)          # (T, D)

    attn_out = jnp.dot(ctx, wo, preferred_element_type=jnp.float32) + bo

    x1 = _layer_norm(x + attn_out, g1, b1, eps)

    hidden = jnp.maximum(
        jnp.dot(x1.astype(jnp.bfloat16), w1, preferred_element_type=jnp.float32) + bf1,
        0.0)
    ff = jnp.dot(hidden.astype(jnp.bfloat16), w2,
                 preferred_element_type=jnp.float32) + bf2
    return _layer_norm(x1 + ff, g2, b2, eps)


# ----------------------------------------------------------------------------
# Fused whole-stack Pallas kernel: grid = (batch, layer)
# ----------------------------------------------------------------------------
def _transformer_kernel(lens_ref,                                   # SMEM prefetch
                        x_ref,                                      # (1, T, D)
                        wqkv_ref, bqkv_ref, wo_ref, bo_ref,
                        g1_ref, b1_ref, w1_ref, bf1_ref,
                        w2_ref, bf2_ref, g2_ref, b2_ref,            # per-layer blocks
                        gf_ref, bfn_ref,                            # final LayerNorm
                        y_ref, avg_ref,                             # outputs
                        act_ref,                                    # VMEM scratch (T, D)
                        *, nhead, eps, T):
    b = pl.program_id(0)
    l = pl.program_id(1)

    @pl.when(l == 0)
    def _():
        act_ref[...] = x_ref[0]

    y = _encoder_layer_math(
        act_ref[...],
        wqkv_ref[0], bqkv_ref[0], wo_ref[0], bo_ref[0],
        g1_ref[0], b1_ref[0], w1_ref[0], bf1_ref[0],
        w2_ref[0], bf2_ref[0], g2_ref[0], b2_ref[0],
        nhead=nhead, eps=eps)
    act_ref[...] = y

    @pl.when(l == pl.num_programs(1) - 1)
    def _():
        yf = _layer_norm(y, gf_ref[...], bfn_ref[...], eps)          # encoder_norm
        y_ref[0] = yf
        # Masked mean over the first lens[b] timesteps (lens lives in SMEM).
        n = lens_ref[b]
        t_idx = jax.lax.broadcasted_iota(jnp.int32, (T, 1), 0)
        mask = (t_idx < n).astype(jnp.float32)
        denom = jnp.maximum(n, 1).astype(jnp.float32)                # guard lens == 0
        avg_ref[0] = jnp.sum(yf * mask, axis=0, keepdims=True) / denom


# ----------------------------------------------------------------------------
# Wrapper
# ----------------------------------------------------------------------------
def transformer_forward(params, encoder_norm, x_btd, lens_i32, *, nhead, eps):
    """Equivalent of Transformer.forward(input_x, lens) in eval mode.

    x_btd: (B, T, d_model) float32; lens_i32: (B,) int32 device array.
    Returns (output (B, T, d_model), avg_output (B, d_model)).
    """
    B, T, D = x_btd.shape
    L = params["wqkv_t"].shape[0]
    F = params["w1_t"].shape[2]
    assert D % nhead == 0

    kernel = functools.partial(_transformer_kernel, nhead=nhead, eps=eps, T=T)

    def per_layer(shape):  # streamed per layer: block index follows l
        return pl.BlockSpec((1,) + shape,
                            lambda b, l, lens: (l,) + (0,) * len(shape))

    def shared(shape):     # constant block (final LayerNorm params)
        return pl.BlockSpec(shape, lambda b, l, lens: (0,) * len(shape))

    in_specs = [
        pl.BlockSpec((1, T, D), lambda b, l, lens: (b, 0, 0)),        # x
        per_layer((D, 3 * D)), per_layer((1, 3 * D)),                 # wqkv, bqkv
        per_layer((D, D)), per_layer((1, D)),                         # wo, bo
        per_layer((1, D)), per_layer((1, D)),                         # g1, b1
        per_layer((D, F)), per_layer((1, F)),                         # w1, bf1
        per_layer((F, D)), per_layer((1, D)),                         # w2, bf2
        per_layer((1, D)), per_layer((1, D)),                         # g2, b2
        shared((1, D)), shared((1, D)),                               # final norm g, b
    ]
    out_specs = [
        pl.BlockSpec((1, T, D), lambda b, l, lens: (b, 0, 0)),
        pl.BlockSpec((1, 1, D), lambda b, l, lens: (b, 0, 0)),
    ]
    grid_spec = pltpu.PrefetchScalarGridSpec(
        num_scalar_prefetch=1,
        grid=(B, L),
        in_specs=in_specs,
        out_specs=out_specs,
        scratch_shapes=[pltpu.VMEM((T, D), jnp.float32)],             # resident activation
    )
    out, avg = pl.pallas_call(
        kernel,
        out_shape=(jax.ShapeDtypeStruct((B, T, D), jnp.float32),
                   jax.ShapeDtypeStruct((B, 1, D), jnp.float32)),
        grid_spec=grid_spec,
        compiler_params=pltpu.CompilerParams(
            dimension_semantics=("parallel", "arbitrary")),
    )(lens_i32.astype(jnp.int32),
      x_btd.astype(jnp.float32),
      params["wqkv_t"].astype(jnp.bfloat16), params["bqkv"],
      params["wo_t"].astype(jnp.bfloat16), params["bo"],
      params["g1"], params["b1"],
      params["w1_t"].astype(jnp.bfloat16), params["bf1"],
      params["w2_t"].astype(jnp.bfloat16), params["bf2"],
      params["g2"], params["b2"],
      encoder_norm["g"], encoder_norm["b"])
    return out, avg.reshape(B, D)


def init_transformer_params(key, d_model, nhead, dim_ff, num_layers):
    """Deterministic init matching PyTorch TransformerEncoderLayer param shapes.

    Weights are pre-transposed for `x @ W`, stacked along a leading layer axis,
    and matmul weights stored as bf16 (halves weight HBM/VMEM traffic).
    """
    def xavier(k, shape):
        fan_out, fan_in = shape
        std = math.sqrt(2.0 / (fan_in + fan_out))
        return std * jax.random.normal(k, shape, jnp.float32)

    layers = []
    for _ in range(num_layers):
        key, k1, k2, k3, k4, k5 = jax.random.split(key, 6)
        layers.append(dict(
            wqkv_t=xavier(k1, (3 * d_model, d_model)).T,               # (D, 3D)
            bqkv=(0.02 * jax.random.normal(k5, (3 * d_model,), jnp.float32)
                  ).reshape(1, -1),                                    # (1, 3D)
            wo_t=xavier(k2, (d_model, d_model)).T,                     # (D, D)
            bo=jnp.zeros((1, d_model), jnp.float32),
            g1=jnp.ones((1, d_model), jnp.float32),
            b1=jnp.zeros((1, d_model), jnp.float32),
            w1_t=xavier(k3, (dim_ff, d_model)).T,                      # (D, F)
            bf1=jnp.zeros((1, dim_ff), jnp.float32),
            w2_t=xavier(k4, (d_model, dim_ff)).T,                      # (F, D)
            bf2=jnp.zeros((1, d_model), jnp.float32),
            g2=jnp.ones((1, d_model), jnp.float32),
            b2=jnp.zeros((1, d_model), jnp.float32),
        ))
    stacked = {k: jnp.stack([lp[k] for lp in layers], axis=0) for k in layers[0]}
    for k in ("wqkv_t", "wo_t", "w1_t", "w2_t"):
        stacked[k] = stacked[k].astype(jnp.bfloat16)
    encoder_norm = dict(g=jnp.ones((1, d_model), jnp.float32),
                        b=jnp.zeros((1, d_model), jnp.float32))
    return stacked, encoder_norm


# ----------------------------------------------------------------------------
# Demo
# ----------------------------------------------------------------------------
if __name__ == "__main__":
    d_model, nhead, num_layers, dim_ff = 32, 4, 2, 64
    B, T = 2, 8
    eps = 1e-5

    key = jax.random.PRNGKey(0)
    key, kx = jax.random.split(key)
    x = jax.random.normal(kx, (B, T, d_model), dtype=jnp.float32)
    lens = jnp.array([7, 5], dtype=jnp.int32)               # stays on device (SMEM)

    params, encoder_norm = init_transformer_params(key, d_model, nhead, dim_ff,
                                                   num_layers)

    fwd = jax.jit(functools.partial(transformer_forward, nhead=nhead, eps=eps))
    output, avg_output = fwd(params, encoder_norm, x, lens)
    jax.block_until_ready((output, avg_output))

    assert output.shape == (B, T, d_model)
    assert avg_output.shape == (B, d_model)
    assert bool(jnp.all(jnp.isfinite(output))) and bool(jnp.all(jnp.isfinite(avg_output)))
    print("KERNEL_OK")
</pallas_src>

<mosaic_0001>
module attributes {stable_mosaic.version = 11 : i64} {
  func.func @_transformer_kernel(%arg0: i32, %arg1: i32, %arg2: memref<2xi32, #tpu.memory_space<smem>>, %arg3: memref<1x8x32xf32, #tpu.memory_space<vmem>>, %arg4: memref<1x32x96xbf16, #tpu.memory_space<vmem>>, %arg5: memref<1x1x96xf32, #tpu.memory_space<vmem>>, %arg6: memref<1x32x32xbf16, #tpu.memory_space<vmem>>, %arg7: memref<1x1x32xf32, #tpu.memory_space<vmem>>, %arg8: memref<1x1x32xf32, #tpu.memory_space<vmem>>, %arg9: memref<1x1x32xf32, #tpu.memory_space<vmem>>, %arg10: memref<1x32x64xbf16, #tpu.memory_space<vmem>>, %arg11: memref<1x1x64xf32, #tpu.memory_space<vmem>>, %arg12: memref<1x64x32xbf16, #tpu.memory_space<vmem>>, %arg13: memref<1x1x32xf32, #tpu.memory_space<vmem>>, %arg14: memref<1x1x32xf32, #tpu.memory_space<vmem>>, %arg15: memref<1x1x32xf32, #tpu.memory_space<vmem>>, %arg16: memref<1x32xf32, #tpu.memory_space<vmem>>, %arg17: memref<1x32xf32, #tpu.memory_space<vmem>>, %arg18: memref<1x8x32xf32, #tpu.memory_space<vmem>>, %arg19: memref<1x1x32xf32, #tpu.memory_space<vmem>>, %arg20: memref<8x32xf32, #tpu.memory_space<vmem>>) attributes {dimension_semantics = [#tpu.dimension_semantics<parallel>, #tpu.dimension_semantics<arbitrary>], iteration_bounds = array<i64: 2, 2>, scalar_prefetch = 1 : i64, scratch_operands = 1 : i64, tpu.core_type = #tpu.core_type<tc>, window_params = [{transform_indices = @transform_0, window_bounds = array<i64: 1, 8, 32>}, {transform_indices = @transform_1, window_bounds = array<i64: 1, 32, 96>}, {transform_indices = @transform_2, window_bounds = array<i64: 1, 1, 96>}, {transform_indices = @transform_3, window_bounds = array<i64: 1, 32, 32>}, {transform_indices = @transform_4, window_bounds = array<i64: 1, 1, 32>}, {transform_indices = @transform_5, window_bounds = array<i64: 1, 1, 32>}, {transform_indices = @transform_6, window_bounds = array<i64: 1, 1, 32>}, {transform_indices = @transform_7, window_bounds = array<i64: 1, 32, 64>}, {transform_indices = @transform_8, window_bounds = array<i64: 1, 1, 64>}, {transform_indices = @transform_9, window_bounds = array<i64: 1, 64, 32>}, {transform_indices = @transform_10, window_bounds = array<i64: 1, 1, 32>}, {transform_indices = @transform_11, window_bounds = array<i64: 1, 1, 32>}, {transform_indices = @transform_12, window_bounds = array<i64: 1, 1, 32>}, {pipeline_mode = #tpu.pipeline_mode<synchronous>, transform_indices = @transform_13, window_bounds = array<i64: 1, 32>}, {pipeline_mode = #tpu.pipeline_mode<synchronous>, transform_indices = @transform_14, window_bounds = array<i64: 1, 32>}, {transform_indices = @transform_15, window_bounds = array<i64: 1, 8, 32>}, {transform_indices = @transform_16, window_bounds = array<i64: 1, 1, 32>}]} {
    %c0_i32 = arith.constant 0 : i32
    %0 = arith.cmpi eq, %arg1, %c0_i32 : i32
    %1 = arith.extui %0 : i1 to i32
    %c0_i32_0 = arith.constant 0 : i32
    %2 = arith.cmpi ne, %1, %c0_i32_0 : i32
    scf.if %2 {
      %c0_72 = arith.constant 0 : index
      %c0_73 = arith.constant 0 : index
      %c0_74 = arith.constant 0 : index
      %165 = vector.load %arg3[%c0_72, %c0_73, %c0_74] : memref<1x8x32xf32, #tpu.memory_space<vmem>>, vector<1x8x32xf32>
      %166 = vector.shape_cast %165 : vector<1x8x32xf32> to vector<8x32xf32>
      %c0_75 = arith.constant 0 : index
      %c0_76 = arith.constant 0 : index
      %167 = vector.load %arg20[%c0_75, %c0_76] : memref<8x32xf32, #tpu.memory_space<vmem>>, vector<8x32xf32>
      tpu.vector_store %arg20[%c0_75, %c0_76], %166 {strides = array<i32>} : memref<8x32xf32, #tpu.memory_space<vmem>>, vector<8x32xf32>,
    } else {
    }
    %c0 = arith.constant 0 : index
    %c0_1 = arith.constant 0 : index
    %3 = vector.load %arg20[%c0, %c0_1] : memref<8x32xf32, #tpu.memory_space<vmem>>, vector<8x32xf32>
    %c0_2 = arith.constant 0 : index
    %c0_3 = arith.constant 0 : index
    %c0_4 = arith.constant 0 : index
    %4 = vector.load %arg4[%c0_2, %c0_3, %c0_4] : memref<1x32x96xbf16, #tpu.memory_space<vmem>>, vector<1x32x96xbf16>
    %5 = vector.shape_cast %4 : vector<1x32x96xbf16> to vector<32x96xbf16>
    %c0_5 = arith.constant 0 : index
    %c0_6 = arith.constant 0 : index
    %c0_7 = arith.constant 0 : index
    %6 = vector.load %arg5[%c0_5, %c0_6, %c0_7] : memref<1x1x96xf32, #tpu.memory_space<vmem>>, vector<1x1x96xf32>
    %7 = vector.shape_cast %6 : vector<1x1x96xf32> to vector<1x96xf32>
    %c0_8 = arith.constant 0 : index
    %c0_9 = arith.constant 0 : index
    %c0_10 = arith.constant 0 : index
    %8 = vector.load %arg6[%c0_8, %c0_9, %c0_10] : memref<1x32x32xbf16, #tpu.memory_space<vmem>>, vector<1x32x32xbf16>
    %9 = vector.shape_cast %8 : vector<1x32x32xbf16> to vector<32x32xbf16>
    %c0_11 = arith.constant 0 : index
    %c0_12 = arith.constant 0 : index
    %c0_13 = arith.constant 0 : index
    %10 = vector.load %arg7[%c0_11, %c0_12, %c0_13] : memref<1x1x32xf32, #tpu.memory_space<vmem>>, vector<1x1x32xf32>
    %11 = vector.shape_cast %10 : vector<1x1x32xf32> to vector<1x32xf32>
    %c0_14 = arith.constant 0 : index
    %c0_15 = arith.constant 0 : index
    %c0_16 = arith.constant 0 : index
    %12 = vector.load %arg8[%c0_14, %c0_15, %c0_16] : memref<1x1x32xf32, #tpu.memory_space<vmem>>, vector<1x1x32xf32>
    %13 = vector.shape_cast %12 : vector<1x1x32xf32> to vector<1x32xf32>
    %c0_17 = arith.constant 0 : index
    %c0_18 = arith.constant 0 : index
    %c0_19 = arith.constant 0 : index
    %14 = vector.load %arg9[%c0_17, %c0_18, %c0_19] : memref<1x1x32xf32, #tpu.memory_space<vmem>>, vector<1x1x32xf32>
    %15 = vector.shape_cast %14 : vector<1x1x32xf32> to vector<1x32xf32>
    %c0_20 = arith.constant 0 : index
    %c0_21 = arith.constant 0 : index
    %c0_22 = arith.constant 0 : index
    %16 = vector.load %arg10[%c0_20, %c0_21, %c0_22] : memref<1x32x64xbf16, #tpu.memory_space<vmem>>, vector<1x32x64xbf16>
    %17 = vector.shape_cast %16 : vector<1x32x64xbf16> to vector<32x64xbf16>
    %c0_23 = arith.constant 0 : index
    %c0_24 = arith.constant 0 : index
    %c0_25 = arith.constant 0 : index
    %18 = vector.load %arg11[%c0_23, %c0_24, %c0_25] : memref<1x1x64xf32, #tpu.memory_space<vmem>>, vector<1x1x64xf32>
    %19 = vector.shape_cast %18 : vector<1x1x64xf32> to vector<1x64xf32>
    %c0_26 = arith.constant 0 : index
    %c0_27 = arith.constant 0 : index
    %c0_28 = arith.constant 0 : index
    %20 = vector.load %arg12[%c0_26, %c0_27, %c0_28] : memref<1x64x32xbf16, #tpu.memory_space<vmem>>, vector<1x64x32xbf16>
    %21 = vector.shape_cast %20 : vector<1x64x32xbf16> to vector<64x32xbf16>
    %c0_29 = arith.constant 0 : index
    %c0_30 = arith.constant 0 : index
    %c0_31 = arith.constant 0 : index
    %22 = vector.load %arg13[%c0_29, %c0_30, %c0_31] : memref<1x1x32xf32, #tpu.memory_space<vmem>>, vector<1x1x32xf32>
    %23 = vector.shape_cast %22 : vector<1x1x32xf32> to vector<1x32xf32>
    %c0_32 = arith.constant 0 : index
    %c0_33 = arith.constant 0 : index
    %c0_34 = arith.constant 0 : index
    %24 = vector.load %arg14[%c0_32, %c0_33, %c0_34] : memref<1x1x32xf32, #tpu.memory_space<vmem>>, vector<1x1x32xf32>
    %25 = vector.shape_cast %24 : vector<1x1x32xf32> to vector<1x32xf32>
    %c0_35 = arith.constant 0 : index
    %c0_36 = arith.constant 0 : index
    %c0_37 = arith.constant 0 : index
    %26 = vector.load %arg15[%c0_35, %c0_36, %c0_37] : memref<1x1x32xf32, #tpu.memory_space<vmem>>, vector<1x1x32xf32>
    %27 = vector.shape_cast %26 : vector<1x1x32xf32> to vector<1x32xf32>
    %28 = arith.truncf %3 : vector<8x32xf32> to vector<8x32xbf16>
    %cst = arith.constant dense<0.000000e+00> : vector<8x96xf32>
    %29 = tpu.matmul %28, %5, %cst {dimension_numbers = #tpu.dot_dimension_numbers<[1], [0], [0], [1], [0, 0, 1, 1], [], []>} : vector<8x32xbf16>, vector<32x96xbf16>, vector<8x96xf32> -> vector<8x96xf32>
    %30 = vector.broadcast %7 : vector<1x96xf32> to vector<8x96xf32>
    %31 = arith.addf %29, %30 : vector<8x96xf32>
    %32 = vector.extract_strided_slice %31 {offsets = [0, 0], sizes = [8, 32], strides = [1, 1]} : vector<8x96xf32> to vector<8x32xf32>
    %cst_38 = arith.constant 0.353553385 : f32
    %33 = vector.broadcast %cst_38 : f32 to vector<8x32xf32>
    %34 = arith.mulf %32, %33 : vector<8x32xf32>
    %35 = arith.truncf %34 : vector<8x32xf32> to vector<8x32xbf16>
    %36 = vector.extract_strided_slice %31 {offsets = [0, 32], sizes = [8, 32], strides = [1, 1]} : vector<8x96xf32> to vector<8x32xf32>
    %37 = arith.truncf %36 : vector<8x32xf32> to vector<8x32xbf16>
    %38 = vector.extract_strided_slice %31 {offsets = [0, 64], sizes = [8, 32], strides = [1, 1]} : vector<8x96xf32> to vector<8x32xf32>
    %39 = arith.truncf %38 : vector<8x32xf32> to vector<8x32xbf16>
    %40 = vector.extract_strided_slice %35 {offsets = [0, 0], sizes = [8, 8], strides = [1, 1]} : vector<8x32xbf16> to vector<8x8xbf16>
    %41 = vector.extract_strided_slice %37 {offsets = [0, 0], sizes = [8, 8], strides = [1, 1]} : vector<8x32xbf16> to vector<8x8xbf16>
    %42 = vector.extract_strided_slice %39 {offsets = [0, 0], sizes = [8, 8], strides = [1, 1]} : vector<8x32xbf16> to vector<8x8xbf16>
    %cst_39 = arith.constant dense<0.000000e+00> : vector<8x8xf32>
    %43 = tpu.matmul %40, %41, %cst_39 {dimension_numbers = #tpu.dot_dimension_numbers<[1], [1], [0], [0], [0, 0, 1, 0], [], []>} : vector<8x8xbf16>, vector<8x8xbf16>, vector<8x8xf32> -> vector<8x8xf32>
    %cst_40 = arith.constant dense<0xFF800000> : vector<8xf32>
    %44 = vector.multi_reduction <maximumf>, %43, %cst_40 [1] : vector<8x8xf32> to vector<8xf32>
    %45 = vector.shape_cast %44 : vector<8xf32> to vector<8x1xf32>
    %46 = vector.broadcast %45 : vector<8x1xf32> to vector<8x8xf32>
    %47 = arith.subf %43, %46 : vector<8x8xf32>
    %48 = math.exp %47 : vector<8x8xf32>
    %cst_41 = arith.constant dense<0.000000e+00> : vector<8xf32>
    %49 = vector.multi_reduction <add>, %48, %cst_41 [1] : vector<8x8xf32> to vector<8xf32>
    %50 = vector.shape_cast %49 : vector<8xf32> to vector<8x1xf32>
    %51 = tpu.reciprocal %50 {approx = true} : vector<8x1xf32> -> vector<8x1xf32>
    %52 = arith.truncf %48 : vector<8x8xf32> to vector<8x8xbf16>
    %cst_42 = arith.constant dense<0.000000e+00> : vector<8x8xf32>
    %53 = tpu.matmul %52, %42, %cst_42 {dimension_numbers = #tpu.dot_dimension_numbers<[1], [0], [0], [1], [0, 0, 1, 1], [], []>} : vector<8x8xbf16>, vector<8x8xbf16>, vector<8x8xf32> -> vector<8x8xf32>
    %54 = vector.broadcast %51 : vector<8x1xf32> to vector<8x8xf32>
    %55 = arith.mulf %53, %54 : vector<8x8xf32>
    %56 = vector.extract_strided_slice %35 {offsets = [0, 8], sizes = [8, 8], strides = [1, 1]} : vector<8x32xbf16> to vector<8x8xbf16>
    %57 = vector.extract_strided_slice %37 {offsets = [0, 8], sizes = [8, 8], strides = [1, 1]} : vector<8x32xbf16> to vector<8x8xbf16>
    %58 = vector.extract_strided_slice %39 {offsets = [0, 8], sizes = [8, 8], strides = [1, 1]} : vector<8x32xbf16> to vector<8x8xbf16>
    %cst_43 = arith.constant dense<0.000000e+00> : vector<8x8xf32>
    %59 = tpu.matmul %56, %57, %cst_43 {dimension_numbers = #tpu.dot_dimension_numbers<[1], [1], [0], [0], [0, 0, 1, 0], [], []>} : vector<8x8xbf16>, vector<8x8xbf16>, vector<8x8xf32> -> vector<8x8xf32>
    %cst_44 = arith.constant dense<0xFF800000> : vector<8xf32>
    %60 = vector.multi_reduction <maximumf>, %59, %cst_44 [1] : vector<8x8xf32> to vector<8xf32>
    %61 = vector.shape_cast %60 : vector<8xf32> to vector<8x1xf32>
    %62 = vector.broadcast %61 : vector<8x1xf32> to vector<8x8xf32>
    %63 = arith.subf %59, %62 : vector<8x8xf32>
    %64 = math.exp %63 : vector<8x8xf32>
    %cst_45 = arith.constant dense<0.000000e+00> : vector<8xf32>
    %65 = vector.multi_reduction <add>, %64, %cst_45 [1] : vector<8x8xf32> to vector<8xf32>
    %66 = vector.shape_cast %65 : vector<8xf32> to vector<8x1xf32>
    %67 = tpu.reciprocal %66 {approx = true} : vector<8x1xf32> -> vector<8x1xf32>
    %68 = arith.truncf %64 : vector<8x8xf32> to vector<8x8xbf16>
    %cst_46 = arith.constant dense<0.000000e+00> : vector<8x8xf32>
    %69 = tpu.matmul %68, %58, %cst_46 {dimension_numbers = #tpu.dot_dimension_numbers<[1], [0], [0], [1], [0, 0, 1, 1], [], []>} : vector<8x8xbf16>, vector<8x8xbf16>, vector<8x8xf32> -> vector<8x8xf32>
    %70 = vector.broadcast %67 : vector<8x1xf32> to vector<8x8xf32>
    %71 = arith.mulf %69, %70 : vector<8x8xf32>
    %72 = vector.extract_strided_slice %35 {offsets = [0, 16], sizes = [8, 8], strides = [1, 1]} : vector<8x32xbf16> to vector<8x8xbf16>
    %73 = vector.extract_strided_slice %37 {offsets = [0, 16], sizes = [8, 8], strides = [1, 1]} : vector<8x32xbf16> to vector<8x8xbf16>
    %74 = vector.extract_strided_slice %39 {offsets = [0, 16], sizes = [8, 8], strides = [1, 1]} : vector<8x32xbf16> to vector<8x8xbf16>
    %cst_47 = arith.constant dense<0.000000e+00> : vector<8x8xf32>
    %75 = tpu.matmul %72, %73, %cst_47 {dimension_numbers = #tpu.dot_dimension_numbers<[1], [1], [0], [0], [0, 0, 1, 0], [], []>} : vector<8x8xbf16>, vector<8x8xbf16>, vector<8x8xf32> -> vector<8x8xf32>
    %cst_48 = arith.constant dense<0xFF800000> : vector<8xf32>
    %76 = vector.multi_reduction <maximumf>, %75, %cst_48 [1] : vector<8x8xf32> to vector<8xf32>
    %77 = vector.shape_cast %76 : vector<8xf32> to vector<8x1xf32>
    %78 = vector.broadcast %77 : vector<8x1xf32> to vector<8x8xf32>
    %79 = arith.subf %75, %78 : vector<8x8xf32>
    %80 = math.exp %79 : vector<8x8xf32>
    %cst_49 = arith.constant dense<0.000000e+00> : vector<8xf32>
    %81 = vector.multi_reduction <add>, %80, %cst_49 [1] : vector<8x8xf32> to vector<8xf32>
    %82 = vector.shape_cast %81 : vector<8xf32> to vector<8x1xf32>
    %83 = tpu.reciprocal %82 {approx = true} : vector<8x1xf32> -> vector<8x1xf32>
    %84 = arith.truncf %80 : vector<8x8xf32> to vector<8x8xbf16>
    %cst_50 = arith.constant dense<0.000000e+00> : vector<8x8xf32>
    %85 = tpu.matmul %84, %74, %cst_50 {dimension_numbers = #tpu.dot_dimension_numbers<[1], [0], [0], [1], [0, 0, 1, 1], [], []>} : vector<8x8xbf16>, vector<8x8xbf16>, vector<8x8xf32> -> vector<8x8xf32>
    %86 = vector.broadcast %83 : vector<8x1xf32> to vector<8x8xf32>
    %87 = arith.mulf %85, %86 : vector<8x8xf32>
    %88 = vector.extract_strided_slice %35 {offsets = [0, 24], sizes = [8, 8], strides = [1, 1]} : vector<8x32xbf16> to vector<8x8xbf16>
    %89 = vector.extract_strided_slice %37 {offsets = [0, 24], sizes = [8, 8], strides = [1, 1]} : vector<8x32xbf16> to vector<8x8xbf16>
    %90 = vector.extract_strided_slice %39 {offsets = [0, 24], sizes = [8, 8], strides = [1, 1]} : vector<8x32xbf16> to vector<8x8xbf16>
    %cst_51 = arith.constant dense<0.000000e+00> : vector<8x8xf32>
    %91 = tpu.matmul %88, %89, %cst_51 {dimension_numbers = #tpu.dot_dimension_numbers<[1], [1], [0], [0], [0, 0, 1, 0], [], []>} : vector<8x8xbf16>, vector<8x8xbf16>, vector<8x8xf32> -> vector<8x8xf32>
    %cst_52 = arith.constant dense<0xFF800000> : vector<8xf32>
    %92 = vector.multi_reduction <maximumf>, %91, %cst_52 [1] : vector<8x8xf32> to vector<8xf32>
    %93 = vector.shape_cast %92 : vector<8xf32> to vector<8x1xf32>
    %94 = vector.broadcast %93 : vector<8x1xf32> to vector<8x8xf32>
    %95 = arith.subf %91, %94 : vector<8x8xf32>
    %96 = math.exp %95 : vector<8x8xf32>
    %cst_53 = arith.constant dense<0.000000e+00> : vector<8xf32>
    %97 = vector.multi_reduction <add>, %96, %cst_53 [1] : vector<8x8xf32> to vector<8xf32>
    %98 = vector.shape_cast %97 : vector<8xf32> to vector<8x1xf32>
    %99 = tpu.reciprocal %98 {approx = true} : vector<8x1xf32> -> vector<8x1xf32>
    %100 = arith.truncf %96 : vector<8x8xf32> to vector<8x8xbf16>
    %cst_54 = arith.constant dense<0.000000e+00> : vector<8x8xf32>
    %101 = tpu.matmul %100, %90, %cst_54 {dimension_numbers = #tpu.dot_dimension_numbers<[1], [0], [0], [1], [0, 0, 1, 1], [], []>} : vector<8x8xbf16>, vector<8x8xbf16>, vector<8x8xf32> -> vector<8x8xf32>
    %102 = vector.broadcast %99 : vector<8x1xf32> to vector<8x8xf32>
    %103 = arith.mulf %101, %102 : vector<8x8xf32>
    %104 = tpu.concatenate %55, %71, %87, %103 in 1 : vector<8x8xf32>, vector<8x8xf32>, vector<8x8xf32>, vector<8x8xf32> -> vector<8x32xf32>
    %105 = arith.truncf %104 : vector<8x32xf32> to vector<8x32xbf16>
    %cst_55 = arith.constant dense<0.000000e+00> : vector<8x32xf32>
    %106 = tpu.matmul %105, %9, %cst_55 {dimension_numbers = #tpu.dot_dimension_numbers<[1], [0], [0], [1], [0, 0, 1, 1], [], []>} : vector<8x32xbf16>, vector<32x32xbf16>, vector<8x32xf32> -> vector<8x32xf32>
    %107 = vector.broadcast %11 : vector<1x32xf32> to vector<8x32xf32>
    %108 = arith.addf %106, %107 : vector<8x32xf32>
    %109 = arith.addf %3, %108 : vector<8x32xf32>
    %cst_56 = arith.constant dense<0.000000e+00> : vector<8xf32>
    %110 = vector.multi_reduction <add>, %109, %cst_56 [1] : vector<8x32xf32> to vector<8xf32>
    %111 = vector.shape_cast %110 : vector<8xf32> to vector<8x1xf32>
    %cst_57 = arith.constant 3.200000e+01 : f32
    %112 = vector.broadcast %cst_57 : f32 to vector<8x1xf32>
    %113 = arith.divf %111, %112 : vector<8x1xf32>
    %114 = vector.broadcast %113 : vector<8x1xf32> to vector<8x32xf32>
    %115 = arith.subf %109, %114 : vector<8x32xf32>
    %116 = arith.mulf %115, %115 : vector<8x32xf32>
    %cst_58 = arith.constant dense<0.000000e+00> : vector<8xf32>
    %117 = vector.multi_reduction <add>, %116, %cst_58 [1] : vector<8x32xf32> to vector<8xf32>
    %118 = vector.shape_cast %117 : vector<8xf32> to vector<8x1xf32>
    %cst_59 = arith.constant 3.200000e+01 : f32
    %119 = vector.broadcast %cst_59 : f32 to vector<8x1xf32>
    %120 = arith.divf %118, %119 : vector<8x1xf32>
    %cst_60 = arith.constant 9.99999974E-6 : f32
    %121 = vector.broadcast %cst_60 : f32 to vector<8x1xf32>
    %122 = arith.addf %120, %121 : vector<8x1xf32>
    %123 = math.rsqrt %122 : vector<8x1xf32>
    %124 = vector.broadcast %123 : vector<8x1xf32> to vector<8x32xf32>
    %125 = arith.mulf %115, %124 : vector<8x32xf32>
    %126 = vector.broadcast %13 : vector<1x32xf32> to vector<8x32xf32>
    %127 = arith.mulf %125, %126 : vector<8x32xf32>
    %128 = vector.broadcast %15 : vector<1x32xf32> to vector<8x32xf32>
    %129 = arith.addf %127, %128 : vector<8x32xf32>
    %130 = arith.truncf %129 : vector<8x32xf32> to vector<8x32xbf16>
    %cst_61 = arith.constant dense<0.000000e+00> : vector<8x64xf32>
    %131 = tpu.matmul %130, %17, %cst_61 {dimension_numbers = #tpu.dot_dimension_numbers<[1], [0], [0], [1], [0, 0, 1, 1], [], []>} : vector<8x32xbf16>, vector<32x64xbf16>, vector<8x64xf32> -> vector<8x64xf32>
    %132 = vector.broadcast %19 : vector<1x64xf32> to vector<8x64xf32>
    %133 = arith.addf %131, %132 : vector<8x64xf32>
    %cst_62 = arith.constant 0.000000e+00 : f32
    %134 = vector.broadcast %cst_62 : f32 to vector<8x64xf32>
    %135 = arith.maximumf %133, %134 : vector<8x64xf32>
    %136 = arith.truncf %135 : vector<8x64xf32> to vector<8x64xbf16>
    %cst_63 = arith.constant dense<0.000000e+00> : vector<8x32xf32>
    %137 = tpu.matmul %136, %21, %cst_63 {dimension_numbers = #tpu.dot_dimension_numbers<[1], [0], [0], [1], [0, 0, 1, 1], [], []>} : vector<8x64xbf16>, vector<64x32xbf16>, vector<8x32xf32> -> vector<8x32xf32>
    %138 = vector.broadcast %23 : vector<1x32xf32> to vector<8x32xf32>
    %139 = arith.addf %137, %138 : vector<8x32xf32>
    %140 = arith.addf %129, %139 : vector<8x32xf32>
    %cst_64 = arith.constant dense<0.000000e+00> : vector<8xf32>
    %141 = vector.multi_reduction <add>, %140, %cst_64 [1] : vector<8x32xf32> to vector<8xf32>
    %142 = vector.shape_cast %141 : vector<8xf32> to vector<8x1xf32>
    %cst_65 = arith.constant 3.200000e+01 : f32
    %143 = vector.broadcast %cst_65 : f32 to vector<8x1xf32>
    %144 = arith.divf %142, %143 : vector<8x1xf32>
    %145 = vector.broadcast %144 : vector<8x1xf32> to vector<8x32xf32>
    %146 = arith.subf %140, %145 : vector<8x32xf32>
    %147 = arith.mulf %146, %146 : vector<8x32xf32>
    %cst_66 = arith.constant dense<0.000000e+00> : vector<8xf32>
    %148 = vector.multi_reduction <add>, %147, %cst_66 [1] : vector<8x32xf32> to vector<8xf32>
    %149 = vector.shape_cast %148 : vector<8xf32> to vector<8x1xf32>
    %cst_67 = arith.constant 3.200000e+01 : f32
    %150 = vector.broadcast %cst_67 : f32 to vector<8x1xf32>
    %151 = arith.divf %149, %150 : vector<8x1xf32>
    %cst_68 = arith.constant 9.99999974E-6 : f32
    %152 = vector.broadcast %cst_68 : f32 to vector<8x1xf32>
    %153 = arith.addf %151, %152 : vector<8x1xf32>
    %154 = math.rsqrt %153 : vector<8x1xf32>
    %155 = vector.broadcast %154 : vector<8x1xf32> to vector<8x32xf32>
    %156 = arith.mulf %146, %155 : vector<8x32xf32>
    %157 = vector.broadcast %25 : vector<1x32xf32> to vector<8x32xf32>
    %158 = arith.mulf %156, %157 : vector<8x32xf32>
    %159 = vector.broadcast %27 : vector<1x32xf32> to vector<8x32xf32>
    %160 = arith.addf %158, %159 : vector<8x32xf32>
    %c0_69 = arith.constant 0 : index
    %c0_70 = arith.constant 0 : index
    %161 = vector.load %arg20[%c0_69, %c0_70] : memref<8x32xf32, #tpu.memory_space<vmem>>, vector<8x32xf32>
    tpu.vector_store %arg20[%c0_69, %c0_70], %160 {strides = array<i32>} : memref<8x32xf32, #tpu.memory_space<vmem>>, vector<8x32xf32>,
    %c1_i32 = arith.constant 1 : i32
    %162 = arith.cmpi eq, %arg1, %c1_i32 : i32
    %163 = arith.extui %162 : i1 to i32
    %c0_i32_71 = arith.constant 0 : i32
    %164 = arith.cmpi ne, %163, %c0_i32_71 : i32
    scf.if %164 {
      %c0_72 = arith.constant 0 : index
      %c0_73 = arith.constant 0 : index
      %165 = vector.load %arg16[%c0_72, %c0_73] : memref<1x32xf32, #tpu.memory_space<vmem>>, vector<1x32xf32>
      %c0_74 = arith.constant 0 : index
      %c0_75 = arith.constant 0 : index
      %166 = vector.load %arg17[%c0_74, %c0_75] : memref<1x32xf32, #tpu.memory_space<vmem>>, vector<1x32xf32>
      %cst_76 = arith.constant dense<0.000000e+00> : vector<8xf32>
      %167 = vector.multi_reduction <add>, %160, %cst_76 [1] : vector<8x32xf32> to vector<8xf32>
      %168 = vector.shape_cast %167 : vector<8xf32> to vector<8x1xf32>
      %cst_77 = arith.constant 3.200000e+01 : f32
      %169 = vector.broadcast %cst_77 : f32 to vector<8x1xf32>
      %170 = arith.divf %168, %169 : vector<8x1xf32>
      %171 = vector.broadcast %170 : vector<8x1xf32> to vector<8x32xf32>
      %172 = arith.subf %160, %171 : vector<8x32xf32>
      %173 = arith.mulf %172, %172 : vector<8x32xf32>
      %cst_78 = arith.constant dense<0.000000e+00> : vector<8xf32>
      %174 = vector.multi_reduction <add>, %173, %cst_78 [1] : vector<8x32xf32> to vector<8xf32>
      %175 = vector.shape_cast %174 : vector<8xf32> to vector<8x1xf32>
      %cst_79 = arith.constant 3.200000e+01 : f32
      %176 = vector.broadcast %cst_79 : f32 to vector<8x1xf32>
      %177 = arith.divf %175, %176 : vector<8x1xf32>
      %cst_80 = arith.constant 9.99999974E-6 : f32
      %178 = vector.broadcast %cst_80 : f32 to vector<8x1xf32>
      %179 = arith.addf %177, %178 : vector<8x1xf32>
      %180 = math.rsqrt %179 : vector<8x1xf32>
      %181 = vector.broadcast %180 : vector<8x1xf32> to vector<8x32xf32>
      %182 = arith.mulf %172, %181 : vector<8x32xf32>
      %183 = vector.broadcast %165 : vector<1x32xf32> to vector<8x32xf32>
      %184 = arith.mulf %182, %183 : vector<8x32xf32>
      %185 = vector.broadcast %166 : vector<1x32xf32> to vector<8x32xf32>
      %186 = arith.addf %184, %185 : vector<8x32xf32>
      %c0_81 = arith.constant 0 : index
      %c0_82 = arith.constant 0 : index
      %c0_83 = arith.constant 0 : index
      %187 = vector.load %arg18[%c0_81, %c0_82, %c0_83] : memref<1x8x32xf32, #tpu.memory_space<vmem>>, vector<1x8x32xf32>
      %188 = vector.shape_cast %187 : vector<1x8x32xf32> to vector<8x32xf32>
      %189 = vector.shape_cast %186 : vector<8x32xf32> to vector<1x8x32xf32>
      tpu.vector_store %arg18[%c0_81, %c0_82, %c0_83], %189 {strides = array<i32>} : memref<1x8x32xf32, #tpu.memory_space<vmem>>, vector<1x8x32xf32>,
      %190 = arith.index_cast %arg0 : i32 to index
      %191 = memref.load %arg2[%190] : memref<2xi32, #tpu.memory_space<smem>>
      %192 = tpu.iota {dimensions = array<i32: 0>} : vector<8x1xi32>
      %193 = vector.broadcast %191 : i32 to vector<8x1xi32>
      %194 = arith.cmpi slt, %192, %193 : vector<8x1xi32>
      %195 = arith.extui %194 : vector<8x1xi1> to vector<8x1xi32>
      %196 = arith.sitofp %195 : vector<8x1xi32> to vector<8x1xf32>
      %c1_i32_84 = arith.constant 1 : i32
      %197 = arith.maxsi %191, %c1_i32_84 : i32
      %198 = arith.sitofp %197 : i32 to f32
      %199 = vector.broadcast %196 : vector<8x1xf32> to vector<8x32xf32>
      %200 = arith.mulf %186, %199 : vector<8x32xf32>
      %cst_85 = arith.constant dense<0.000000e+00> : vector<32xf32>
      %201 = vector.multi_reduction <add>, %200, %cst_85 [0] : vector<8x32xf32> to vector<32xf32>
      %202 = vector.shape_cast %201 : vector<32xf32> to vector<1x32xf32>
      %203 = vector.broadcast %198 : f32 to vector<1x32xf32>
      %204 = arith.divf %202, %203 : vector<1x32xf32>
      %c0_86 = arith.constant 0 : index
      %c0_87 = arith.constant 0 : index
      %c0_88 = arith.constant 0 : index
      %205 = vector.load %arg19[%c0_86, %c0_87, %c0_88] : memref<1x1x32xf32, #tpu.memory_space<vmem>>, vector<1x1x32xf32>
      %206 = vector.shape_cast %205 : vector<1x1x32xf32> to vector<1x32xf32>
      %207 = vector.shape_cast %204 : vector<1x32xf32> to vector<1x1x32xf32>
      tpu.vector_store %arg19[%c0_86, %c0_87, %c0_88], %207 {strides = array<i32>} : memref<1x1x32xf32, #tpu.memory_space<vmem>>, vector<1x1x32xf32>,
    } else {
    }
    return
  }
  func.func @transform_0(%arg0: i32, %arg1: i32, %arg2: memref<2xi32, #tpu.memory_space<smem>>) -> (i32, i32, i32) {
    %c0_i32 = arith.constant 0 : i32
    %c0_i32_0 = arith.constant 0 : i32
    %c0_i32_1 = arith.constant 0 : i32
    return %arg0, %c0_i32, %c0_i32_0 : i32, i32, i32
  }
  func.func @transform_1(%arg0: i32, %arg1: i32, %arg2: memref<2xi32, #tpu.memory_space<smem>>) -> (i32, i32, i32) {
    %c0_i32 = arith.constant 0 : i32
    %c0_i32_0 = arith.constant 0 : i32
    %c0_i32_1 = arith.constant 0 : i32
    return %arg1, %c0_i32, %c0_i32_0 : i32, i32, i32
  }
  func.func @transform_2(%arg0: i32, %arg1: i32, %arg2: memref<2xi32, #tpu.memory_space<smem>>) -> (i32, i32, i32) {
    %c0_i32 = arith.constant 0 : i32
    %c0_i32_0 = arith.constant 0 : i32
    %c0_i32_1 = arith.constant 0 : i32
    return %arg1, %c0_i32, %c0_i32_0 : i32, i32, i32
  }
  func.func @transform_3(%arg0: i32, %arg1: i32, %arg2: memref<2xi32, #tpu.memory_space<smem>>) -> (i32, i32, i32) {
    %c0_i32 = arith.constant 0 : i32
    %c0_i32_0 = arith.constant 0 : i32
    %c0_i32_1 = arith.constant 0 : i32
    return %arg1, %c0_i32, %c0_i32_0 : i32, i32, i32
  }
  func.func @transform_4(%arg0: i32, %arg1: i32, %arg2: memref<2xi32, #tpu.memory_space<smem>>) -> (i32, i32, i32) {
    %c0_i32 = arith.constant 0 : i32
    %c0_i32_0 = arith.constant 0 : i32
    %c0_i32_1 = arith.constant 0 : i32
    return %arg1, %c0_i32, %c0_i32_0 : i32, i32, i32
  }
  func.func @transform_5(%arg0: i32, %arg1: i32, %arg2: memref<2xi32, #tpu.memory_space<smem>>) -> (i32, i32, i32) {
    %c0_i32 = arith.constant 0 : i32
    %c0_i32_0 = arith.constant 0 : i32
    %c0_i32_1 = arith.constant 0 : i32
    return %arg1, %c0_i32, %c0_i32_0 : i32, i32, i32
  }
  func.func @transform_6(%arg0: i32, %arg1: i32, %arg2: memref<2xi32, #tpu.memory_space<smem>>) -> (i32, i32, i32) {
    %c0_i32 = arith.constant 0 : i32
    %c0_i32_0 = arith.constant 0 : i32
    %c0_i32_1 = arith.constant 0 : i32
    return %arg1, %c0_i32, %c0_i32_0 : i32, i32, i32
  }
  func.func @transform_7(%arg0: i32, %arg1: i32, %arg2: memref<2xi32, #tpu.memory_space<smem>>) -> (i32, i32, i32) {
    %c0_i32 = arith.constant 0 : i32
    %c0_i32_0 = arith.constant 0 : i32
    %c0_i32_1 = arith.constant 0 : i32
    return %arg1, %c0_i32, %c0_i32_0 : i32, i32, i32
  }
  func.func @transform_8(%arg0: i32, %arg1: i32, %arg2: memref<2xi32, #tpu.memory_space<smem>>) -> (i32, i32, i32) {
    %c0_i32 = arith.constant 0 : i32
    %c0_i32_0 = arith.constant 0 : i32
    %c0_i32_1 = arith.constant 0 : i32
    return %arg1, %c0_i32, %c0_i32_0 : i32, i32, i32
  }
  func.func @transform_9(%arg0: i32, %arg1: i32, %arg2: memref<2xi32, #tpu.memory_space<smem>>) -> (i32, i32, i32) {
    %c0_i32 = arith.constant 0 : i32
    %c0_i32_0 = arith.constant 0 : i32
    %c0_i32_1 = arith.constant 0 : i32
    return %arg1, %c0_i32, %c0_i32_0 : i32, i32, i32
  }
  func.func @transform_10(%arg0: i32, %arg1: i32, %arg2: memref<2xi32, #tpu.memory_space<smem>>) -> (i32, i32, i32) {
    %c0_i32 = arith.constant 0 : i32
    %c0_i32_0 = arith.constant 0 : i32
    %c0_i32_1 = arith.constant 0 : i32
    return %arg1, %c0_i32, %c0_i32_0 : i32, i32, i32
  }
  func.func @transform_11(%arg0: i32, %arg1: i32, %arg2: memref<2xi32, #tpu.memory_space<smem>>) -> (i32, i32, i32) {
    %c0_i32 = arith.constant 0 : i32
    %c0_i32_0 = arith.constant 0 : i32
    %c0_i32_1 = arith.constant 0 : i32
    return %arg1, %c0_i32, %c0_i32_0 : i32, i32, i32
  }
  func.func @transform_12(%arg0: i32, %arg1: i32, %arg2: memref<2xi32, #tpu.memory_space<smem>>) -> (i32, i32, i32) {
    %c0_i32 = arith.constant 0 : i32
    %c0_i32_0 = arith.constant 0 : i32
    %c0_i32_1 = arith.constant 0 : i32
    return %arg1, %c0_i32, %c0_i32_0 : i32, i32, i32
  }
  func.func @transform_13(%arg0: i32, %arg1: i32, %arg2: memref<2xi32, #tpu.memory_space<smem>>) -> (i32, i32) {
    %c0_i32 = arith.constant 0 : i32
    %c0_i32_0 = arith.constant 0 : i32
    %c0_i32_1 = arith.constant 0 : i32
    return %c0_i32, %c0_i32_0 : i32, i32
  }
  func.func @transform_14(%arg0: i32, %arg1: i32, %arg2: memref<2xi32, #tpu.memory_space<smem>>) -> (i32, i32) {
    %c0_i32 = arith.constant 0 : i32
    %c0_i32_0 = arith.constant 0 : i32
    %c0_i32_1 = arith.constant 0 : i32
    return %c0_i32, %c0_i32_0 : i32, i32
  }
  func.func @transform_15(%arg0: i32, %arg1: i32, %arg2: memref<2xi32, #tpu.memory_space<smem>>) -> (i32, i32, i32) {
    %c0_i32 = arith.constant 0 : i32
    %c0_i32_0 = arith.constant 0 : i32
    %c0_i32_1 = arith.constant 0 : i32
    return %arg0, %c0_i32, %c0_i32_0 : i32, i32, i32
  }
  func.func @transform_16(%arg0: i32, %arg1: i32, %arg2: memref<2xi32, #tpu.memory_space<smem>>) -> (i32, i32, i32) {
    %c0_i32 = arith.constant 0 : i32
    %c0_i32_0 = arith.constant 0 : i32
    %c0_i32_1 = arith.constant 0 : i32
    return %arg0, %c0_i32, %c0_i32_0 : i32, i32, i32
  }
}

</mosaic_0001>

<bundles_post_ra>
// kernel: transformer_forward.1
= control target key start
LH: loop header
LB: loop body
LE: loop exit
PB: predicated region body
PF: predicated region fallthrough
CT: control target
= control target key end

     0   :  { %s3850_s0 = inlined_call_operand.vmem [shape: s32[2], index: 0, kind: input, shape index: {}]   ;;  %s3851_s1 = inlined_call_operand.vmem [shape: f32[2,8,32], index: 1, kind: input, shape index: {}]   ;;  %s3852_s2 = inlined_call_operand.vmem [shape: bf16[2,32,96], index: 2, kind: input, shape index: {}]   ;;  %s3853_s3 = inlined_call_operand.hbm [shape: f32[2,1,96], index: 3, kind: input, shape index: {}]   ;;  %s3854_s4 = inlined_call_operand.vmem [shape: bf16[2,32,32], index: 4, kind: input, shape index: {}]   ;;  %s3855_s5 = inlined_call_operand.hbm [shape: f32[2,1,32], index: 5, kind: input, shape index: {}]   ;;  %s3856_s6 = inlined_call_operand.hbm [shape: f32[2,1,32], index: 6, kind: input, shape index: {}]   ;;  %s3857_s7 = inlined_call_operand.hbm [shape: f32[2,1,32], index: 7, kind: input, shape index: {}]   ;;  %s3858_s8 = inlined_call_operand.vmem [shape: bf16[2,32,64], index: 8, kind: input, shape index: {}]   ;;  %s3859_s9 = inlined_call_operand.hbm [shape: f32[2,1,64], index: 9, kind: input, shape index: {}]   ;;  %s3860_s10 = inlined_call_operand.vmem [shape: bf16[2,64,32], index: 10, kind: input, shape index: {}]   ;;  %s3861_s11 = inlined_call_operand.hbm [shape: f32[2,1,32], index: 11, kind: input, shape index: {}]   ;;  %s3862_s12 = inlined_call_operand.hbm [shape: f32[2,1,32], index: 12, kind: input, shape index: {}]   ;;  %s3863_s13 = inlined_call_operand.hbm [shape: f32[2,1,32], index: 13, kind: input, shape index: {}]   ;;  %s3864_s14 = inlined_call_operand.hbm [shape: f32[1,32], index: 14, kind: input, shape index: {}]   ;;  %s3865_s15 = inlined_call_operand.hbm [shape: f32[1,32], index: 15, kind: input, shape index: {}]   ;;  %s3866_s16 = inlined_call_operand.hbm [shape: f32[2,8,32], index: 16, kind: output, shape index: {0}]   ;;  %s3867_s17 = inlined_call_operand.hbm [shape: f32[2,1,32], index: 17, kind: output, shape index: {1}]  }
   0x1   :  { %3896 = sst [smem:[#allocation48_spill]] %s3850_s0 }
   0x2   :  { %3897 = sst [smem:[#allocation49_spill]] %s3851_s1  ;;  %s3912_s26 = sld [smem:[#allocation48_spill]] }
   0x3   :  { %3898 = sst [smem:[#allocation50_spill]] %s3852_s2 }
   0x4   :  { %3899 = sst [smem:[#allocation51_spill]] %s3853_s3 }
   0x5   :  { %3900 = sst [smem:[#allocation52_spill]] %s3854_s4 }
   0x6   :  { %3901 = sst [smem:[#allocation53_spill]] %s3855_s5 }
   0x7   :  { %3902 = sst [smem:[#allocation54_spill]] %s3856_s6 }
   0x8   :  { %3903 = sst [smem:[#allocation55_spill]] %s3857_s7 }
   0x9   :  { %3904 = sst [smem:[#allocation56_spill]] %s3858_s8 }
   0xa   :  { %3905 = sst [smem:[#allocation57_spill]] %s3859_s9 }
   0xb   :  { %3906 = sst [smem:[#allocation58_spill]] %s3860_s10  ;;  %s23_s10 = sshll.u32 %s3912_s26, 4  ;;  %s24_s10 = int_to_ptr.vmem [resolvable:$true] %s23_s10 }
   0xc   :  { %3907 = sst [smem:[#allocation59_spill]] %s3861_s11  ;;  %s2538_s27 = scalar_lea.vmem %s24_s10, 16 }
   0xd   :  { %3908 = sst [smem:[#allocation60_spill]] %s3862_s12  ;;  %p2539_p0 = scmp.ne.s32.totalorder %s24_s10, %s2538_s27 }
   0xe   :  { %3909 = sst [smem:[#allocation61_spill]] %s3864_s14  ;;  %p2543_p1 = scmp.lt.s32.totalorder %s24_s10, %s24_s10 }
   0xf   :  { %3910 = sst [smem:[#allocation62_spill]] %s3866_s16  ;;  %p2544_p2 = scmp.lt.s32.totalorder %s2538_s27, %s2538_s27 }
  0x10   :  { %3911 = sst [smem:[#allocation63_spill]] %s3867_s17 }
  0x11   :  { %p2545_p3 = por %p2544_p2, %p2543_p1 }
  0x13   :  { %p2546_p4 = pnand %p2545_p3, %p2539_p0 }
  0x15   :  { %2549 = shalt.err (!%p2546_p4)  }
  0x16   :  { %s3028_s28 = smov [#allocation4]  }
  0x17   :  { %26 = dma.vmem_to_smem %s24_s10, 16, %s3028_s28, [#allocation3] }
  0x18   :  { %2946 = dma.done.wait [#allocation3], 16 }
  0x19   :  { %2947 = vsyncadd [#allocation3], 4294967280 }
  0x1a   :  { %28 = sfence }
  0x1b   :  { %29 = vsyncpa [#allocation6], 0 }
  0x1c   :  { %31 = vsyncpa [#allocation6 + $0x1], 0 }
  0x1d   :  { %32 = vsyncpa [#allocation9], 0 }
  0x1e   :  { %34 = vsyncpa [#allocation9 + $0x1], 0 }
  0x1f   :  { %35 = vsyncpa [#allocation12], 0 }
  0x20   :  { %37 = vsyncpa [#allocation12 + $0x1], 0 }
  0x21   :  { %38 = vsyncpa [#allocation15], 0 }
  0x22   :  { %40 = vsyncpa [#allocation15 + $0x1], 0 }
  0x23   :  { %41 = vsyncpa [#allocation18], 0 }
  0x24   :  { %43 = vsyncpa [#allocation18 + $0x1], 0 }
  0x25   :  { %44 = vsyncpa [#allocation21], 0 }
  0x26   :  { %45 = vsyncpa [#allocation7], 0 }
  0x27   :  { %47 = vsyncpa [#allocation7 + $0x1], 0 }
  0x28   :  { %48 = vsyncpa [#allocation24], 0 }
  0x29   :  { %50 = vsyncpa [#allocation24 + $0x1], 0  ;;  %s3151_s29 = smov 0   ;;  %s3153_s10 = smov 0  }
  0x2a   :  { %s3155_s0 = smov 0   ;;  %s3157_s30 = smov 0  }
  0x2b   :  { %s3159_s18 = smov 0   ;;  %s3161_s19 = smov 0  }
  0x2c   :  { %s3163_s1 = smov 0   ;;  %s3165_s20 = smov 0  }
  0x2d   :  { %s3167_s21 = smov 0   ;;  %s3169_s22 = smov 0  }
  0x2e   :  { %s3171_s23 = smov 0  }
  0x2f LB: > { %3913 = sst [smem:[#allocation35_spill]] %s2986_s29  ;;  %s3205_s24 = sadd.s32 4294967295, %s3026_s23   ;;  %s3026_s23 = sphi %s3171_s23, %s56_s23   ;;  %s3022_s22 = sphi %s3169_s22, %s3995_s22   ;;  %s3018_s21 = sphi %s3167_s21, %s3994_s21   ;;  %s3014_s20 = sphi %s3165_s20, %s3993_s20   ;;  %s3010_s1 = sphi %s3163_s1, %s3992_s1   ;;  %s3006_s19 = sphi %s3161_s19, %s3991_s19   ;;  %s3002_s18 = sphi %s3159_s18, %s3999_s18   ;;  %s2998_s30 = sphi %s3157_s30, %s3998_s30   ;;  %s2994_s0 = sphi %s3155_s0, %s3989_s0   ;;  %s2990_s10 = sphi %s3153_s10, %s3997_s10   ;;  %s2986_s29 = sphi %s3151_s29, %s3996_s29  }
  0x30   : > { %3914 = sst [smem:[#allocation36_spill]] %s2994_s0  ;;  %s2139_s25 = sadd.s32 4294967294, %s3026_s23  }
  0x31   : > { %3915 = sst [smem:[#allocation37_spill]] %s3006_s19  ;;  %s65_s26 = sadd.s32 1, %s3018_s21 }
  0x32   : > { %3916 = sst [smem:[#allocation38_spill]] %s3010_s1  ;;  %s68_s27 = sadd.s32 1, %s3022_s22 }
  0x33   : > { %3917 = sst [smem:[#allocation39_spill]] %s3018_s21  ;;  %p66_p5 = scmp.ge.s32.totalorder %s65_s26, 2 }
  0x34   : > { %3918 = sst [smem:[#allocation40_spill]] %s3022_s22  ;;  %s127_s28 = sadd.s32 1, %s3006_s19 }
  0x35   : > { %3919 = sst [smem:[#allocation41_spill]] %s3026_s23  ;;  %p134_p6 = scmp.ne.s32.totalorder %s3006_s19, %s3002_s18 }
  0x36   : > { %p135_p7 = scmp.eq.s32.totalorder %s3026_s23, 0  ;;  %s4001_s26 = smov (%p66_p5, %s65_s26), 0 }
  0x37   : > { %3920 = sst [smem:[#allocation42_spill]] %s4001_s26  ;;  %s4003_s27 = smov (!%p66_p5, %s68_s27), %s3022_s22 }
  0x38   : > { %s124_s17 = ssub.s32 %s3018_s21, %s4001_s26  ;;  %p3219_p8 = por %p135_p7, %p134_p6 }
  0x39   : > { %p70_p9 = scmp.ge.s32.totalorder %s4003_s27, 2  ;;  %p125_p10 = scmp.eq.s32.totalorder %s124_s17, 0 }
  0x3a   : > { %p140_p11 = scmp.ne.s32.totalorder %s3002_s18, %s2998_s30  ;;  %p3882_p12 = scmp.eq.s32.totalorder %s3205_s24, 0 }
  0x3b   : > { %s4005_s27 = smov (%p70_p9, %s4003_s27), 0  ;;  %s455_s2 = sadd.s32 1, %s2994_s0 }
  0x3c   : > { %3922 = sst [smem:[#allocation43_spill]] %s4005_s27  ;;  %p3232_p13 = por %p3882_p12, %p140_p11 }
  0x3d   : > { %s3228_s8 = scalar_select %p125_p10, %s3006_s19, %s127_s28  }
  0x3e   : > { %s3924_s26 = scalar_select %p3232_p13, 1, 0 }
  0x3f   : > { %3923 = sst [smem:[#allocation44_spill]] %s3228_s8  ;;  %s452_s4 = ssub.s32 %s3022_s22, %s4005_s27 }
  0x40   : > { %p453_p0 = scmp.eq.s32.totalorder %s452_s4, 0  ;;  %p465_p1 = scmp.ne.s32.totalorder %s2994_s0, %s2990_s10 }
  0x41   : > { %p466_p2 = scmp.eq.s32.totalorder %s3205_s24, 3  ;;  %p471_p4 = scmp.ne.s32.totalorder %s2990_s10, %s2986_s29 }
  0x42   : > { %s3243_s17 = scalar_select %p453_p0, %s2994_s0, %s455_s2  }
  0x43   : > { %p3245_p3 = por %p466_p2, %p465_p1  ;;  %p472_p5 = scmp.eq.s32.totalorder %s2139_s25, 3 }
  0x44   : > { %3925 = sst [smem:[#allocation45_spill]] %s3243_s17  ;;  %p2140_p6 = scmp.ge.s32.totalorder %s3026_s23, 1 }
  0x45   : > { %s3926_s30 = scalar_select %p3245_p3, 1, 0 }
  0x46   : > { %p505_p7 = scmp.lt.s32.totalorder %s3026_s23, 5  ;;  %p3253_p9 = por %p472_p5, %p471_p4 }
  0x47   : > { %3927 = sst [smem:[#allocation46_spill]] %s3926_s30  ;;  %s3029_s2 = smov [#allocation19]  }
  0x48   : > { %s3928_s4 = scalar_select %p3253_p9, 1, 0 }
  0x49   : > { %p3257_p10 = pnand %p2140_p6, %p505_p7  ;;  %s518_s27 = sshll.u32 %s3029_s2, 4  ;;  %s519_s27 = int_to_ptr.vmem [resolvable:$true] %s518_s27 }
  0x4a   : > { %3929 = sst [smem:[#allocation47_spill]] %s3928_s4  ;;  %p2392_p0 = scmp.lt.s32.totalorder %s3026_s23, 4 }
  0x4b   : > { %s3930_s28 = scalar_select %p3257_p10, 1, 0 }
  0x4c   : > { %p2351_p11 = pneg %p3257_p10  ;;  %s3265_s22 = sand.u32 1, %s3006_s19  }
  0x4d   : > { %s3268_s25 = sshll.u32 %s3018_s21, 4  ;;  %p3278_p2 = pnand %p2392_p0, %p3219_p8 }
  0x4e   : > { %p3272_p1 = pnand %p2351_p11, %p3882_p12  ;;  %s3283_s2 = sand.u32 1, %s3026_s23  }
  0x4f   : > { %s3932_s17 = scalar_select %p3278_p2, 1, 0 }
  0x50   : > { %s3931_s8 = scalar_select %p3272_p1, 1, 0 }
  0x51   : > { %s3933_s14 = sld [smem:[#allocation61_spill]]  ;;  %p3887_p5 = pneg %p3272_p1 }
  0x57   : > { %s2550_s19 = scalar_lea.hbm %s3933_s14, 16 }
  0x58   : > { %p2551_p4 = scmp.ne.s32.totalorder %s3933_s14, %s2550_s19  ;;  %p2557_p8 = scmp.lt.u32.totalorder %s2550_s19, %s3933_s14 }
  0x5a   : > { %p2553_p6 = pnand %p3887_p5, %p2551_p4 }
  0x5c   : > { %p2554_p7 = pneg %p2553_p6 }
  0x5e   : > { %p2559_p11 = pnand %p2557_p8, %p2554_p7 }
  0x60   : > { %2562 = shalt.err (!%p2559_p11)
}
  0x61   : > { %s2563_s23 = scalar_lea.vmem %s519_s27, 16  ;;  %s2570_s29 = scalar_lea.vmem %s519_s27, 32 }
  0x62   : > { %p2564_p0 = scmp.ne.s32.totalorder %s519_s27, %s2563_s23  ;;  %p2571_p3 = scmp.lt.s32.totalorder %s519_s27, %s519_s27 }
  0x63   : > { %p2572_p13 = scmp.lt.s32.totalorder %s2570_s29, %s2563_s23 }
  0x64   : > { %p2566_p12 = pnand %p2564_p0, %p3887_p5 }
  0x65   : > { %p2573_p10 = por %p2572_p13, %p2571_p3 }
  0x66   : > { %p2567_p9 = pneg %p2566_p12 }
  0x68   : > { %p2574_p2 = pnand %p2573_p10, %p2567_p9 }
  0x6a   : > { %2577 = shalt.err (!%p2574_p2)
}
  0x6b   : > { %2354 = dma.hbm_to_vmem [thread:$0]  (!%p3272_p1), %s3933_s14, 16, %s519_s27, [#allocation18]  }
  0x6c   : > { %s3934_s5 = sld [smem:[#allocation53_spill]]  ;;  %s583_s23 = scalar_lea.vmem [#allocation8], %s3265_s22 }
  0x6d   : > { %s590_s16 = sshll.u32 %s583_s23, 4  ;;  %p3935_p13 = scmp.ne.s32.totalorder %s3932_s17, 0  ;;  %s3314_s16 = int_to_ptr.vmem [resolvable:$true] %s590_s16 }
  0x6f   : > { %p3321_p3 = pneg %p3935_p13 }
  0x71   : > { %s3936_s21 = scalar_select %p3321_p3, 1, 0 }
  0x72   : > { %s3311_s4 = scalar_lea.hbm %s3934_s5, %s3268_s25  ;;  %s2583_s30 = scalar_lea.hbm %s3934_s5, 32 }
  0x73   : > { %s2578_s0 = scalar_lea.hbm %s3311_s4, 16  ;;  %p2584_p2 = scmp.lt.u32.totalorder %s3311_s4, %s3934_s5 }
  0x74   : > { %p2579_p12 = scmp.ne.s32.totalorder %s3311_s4, %s2578_s0  ;;  %p2585_p4 = scmp.lt.u32.totalorder %s2583_s30, %s2578_s0 }
  0x75   : > { %p2587_p7 = scmp.lt.u32.totalorder %s2578_s0, %s3311_s4 }
  0x76   : > { %p2581_p9 = pnand %p3321_p3, %p2579_p12  ;;  %p2586_p6 = por %p2585_p4, %p2584_p2 }
  0x78   : > { %p2582_p10 = pneg %p2581_p9  ;;  %p2588_p8 = por %p2587_p7, %p2586_p6 }
  0x7a   : > { %p2589_p11 = pnand %p2588_p8, %p2582_p10 }
  0x7c   : > { %2592 = shalt.err (!%p2589_p11)
}
  0x7d   : > { %s2593_s29 = scalar_lea.vmem %s3314_s16, 16  ;;  %s3030_s27 = smov [#allocation8]  }
  0x7e   : > { %p2594_p0 = scmp.ne.s32.totalorder %s3314_s16, %s2593_s29  ;;  %s2598_s19 = sshll.u32 %s3030_s27, 4  ;;  %s2599_s19 = int_to_ptr.vmem [resolvable:$false] %s2598_s19 }
  0x7f   : > { %s2600_s14 = scalar_lea.vmem %s2599_s19, 32  ;;  %p2601_p5 = scmp.lt.s32.totalorder %s3314_s16, %s2599_s19 }
  0x80   : > { %p2596_p12 = pnand %p2594_p0, %p3321_p3  ;;  %p2602_p1 = scmp.lt.s32.totalorder %s2600_s14, %s2593_s29 }
  0x82   : > { %p2597_p9 = pneg %p2596_p12  ;;  %p2603_p2 = por %p2602_p1, %p2601_p5 }
  0x84   : > { %p2604_p4 = pnand %p2603_p2, %p2597_p9 }
  0x86   : > { %2607 = shalt.err (!%p2604_p4)
}
  0x87   : > { %s3937_s0 = scalar_lea.sflag [#allocation9], %s3283_s2  ;;  %s3938_s7 = sld [smem:[#allocation55_spill]] }
  0x88   : > { %2364 = dma.hbm_to_vmem [thread:$0]  (!%p3935_p13), %s3311_s4, 16, %s3314_s16, %s3937_s0  }
  0x89   : > { %s617_s29 = scalar_lea.vmem [#allocation11], %s3265_s22 }
  0x8a   : > { %s624_s19 = sshll.u32 %s617_s29, 4  ;;  %s625_s19 = int_to_ptr.vmem [resolvable:$true] %s624_s19 }
  0x8d   : > { %s3350_s27 = scalar_lea.hbm %s3938_s7, %s3268_s25  ;;  %s2613_s16 = scalar_lea.hbm %s3938_s7, 32 }
  0x8e   : > { %s2608_s5 = scalar_lea.hbm %s3350_s27, 16  ;;  %p2614_p6 = scmp.lt.u32.totalorder %s3350_s27, %s3938_s7 }
  0x8f   : > { %p2609_p1 = scmp.ne.s32.totalorder %s3350_s27, %s2608_s5  ;;  %p2615_p7 = scmp.lt.u32.totalorder %s2613_s16, %s2608_s5 }
  0x90   : > { %p2617_p11 = scmp.lt.u32.totalorder %s2608_s5, %s3350_s27 }
  0x91   : > { %p2611_p5 = pnand %p2609_p1, %p3321_p3  ;;  %p2616_p8 = por %p2615_p7, %p2614_p6 }
  0x93   : > { %p2612_p10 = pneg %p2611_p5  ;;  %p2618_p0 = por %p2617_p11, %p2616_p8 }
  0x95   : > { %p2619_p12 = pnand %p2618_p0, %p2612_p10 }
  0x97   : > { %2622 = shalt.err (!%p2619_p12)
}
  0x98   : > { %s2623_s23 = scalar_lea.vmem %s625_s19, 16  ;;  %s3031_s29 = smov [#allocation11]  }
  0x99   : > { %p2624_p9 = scmp.ne.s32.totalorder %s625_s19, %s2623_s23  ;;  %s2628_s14 = sshll.u32 %s3031_s29, 4  ;;  %s2629_s14 = int_to_ptr.vmem [resolvable:$false] %s2628_s14 }
  0x9a   : > { %s2630_s1 = scalar_lea.vmem %s2629_s14, 32  ;;  %p2631_p1 = scmp.lt.s32.totalorder %s625_s19, %s2629_s14 }
  0x9b   : > { %p2626_p2 = pnand %p2624_p9, %p3321_p3  ;;  %p2632_p5 = scmp.lt.s32.totalorder %s2630_s1, %s2623_s23 }
  0x9d   : > { %p2627_p4 = pneg %p2626_p2  ;;  %p2633_p13 = por %p2632_p5, %p2631_p1 }
  0x9f   : > { %p2634_p6 = pnand %p2633_p13, %p2627_p4 }
  0xa1   : > { %2637 = shalt.err (!%p2634_p6)
}
  0xa2   : > { %p3939_p7 = scmp.ne.s32.totalorder %s3932_s17, 0  ;;  %s3940_s5 = scalar_lea.sflag [#allocation12], %s3283_s2 }
  0xa3   : > { %s3941_s11 = sld [smem:[#allocation59_spill]]  ;;  %s667_s14 = scalar_lea.vmem [#allocation14], %s3265_s22 }
  0xa4   : > { %2370 = dma.hbm_to_vmem [thread:$0]  (!%p3939_p7), %s3350_s27, 16, %s625_s19, %s3940_s5  }
  0xa5   : > { %s674_s30 = sshll.u32 %s667_s14, 4  ;;  %s3032_s23 = smov [#allocation20]   ;;  %s3380_s30 = int_to_ptr.vmem [resolvable:$true] %s674_s30 }
  0xa6   : > { %s3382_s29 = sshll.u32 %s3032_s23, 4  ;;  %s3895_s1 = scalar_lea.sflag [#allocation15], %s3283_s2  ;;  %s530_s29 = int_to_ptr.vmem [resolvable:$true] %s3382_s29 }
  0xa9   : > { %s3377_s0 = scalar_lea.hbm %s3941_s11, %s3268_s25  ;;  %s2643_s5 = scalar_lea.hbm %s3941_s11, 32 }
  0xaa   : > { %s2638_s7 = scalar_lea.hbm %s3377_s0, 16  ;;  %p2644_p11 = scmp.lt.u32.totalorder %s3377_s0, %s3941_s11 }
  0xab   : > { %p2639_p13 = scmp.ne.s32.totalorder %s3377_s0, %s2638_s7  ;;  %p2645_p0 = scmp.lt.u32.totalorder %s2643_s5, %s2638_s7 }
  0xac   : > { %p2647_p9 = scmp.lt.u32.totalorder %s2638_s7, %s3377_s0 }
  0xad   : > { %p2641_p10 = pnand %p2639_p13, %p3321_p3  ;;  %p2646_p12 = por %p2645_p0, %p2644_p11 }
  0xaf   : > { %p2642_p8 = pneg %p2641_p10  ;;  %p2648_p2 = por %p2647_p9, %p2646_p12 }
  0xb1   : > { %p2649_p4 = pnand %p2648_p2, %p2642_p8 }
  0xb3   : > { %2652 = shalt.err (!%p2649_p4)
}
  0xb4   : > { %s2653_s14 = scalar_lea.vmem %s3380_s30, 16  ;;  %s3033_s23 = smov [#allocation14]  }
  0xb5   : > { %p2654_p1 = scmp.ne.s32.totalorder %s3380_s30, %s2653_s14  ;;  %s2658_s27 = sshll.u32 %s3033_s23, 4  ;;  %s2659_s27 = int_to_ptr.vmem [resolvable:$false] %s2658_s27 }
  0xb6   : > { %s2660_s19 = scalar_lea.vmem %s2659_s27, 32  ;;  %p2661_p13 = scmp.lt.s32.totalorder %s3380_s30, %s2659_s27 }
  0xb7   : > { %p2656_p5 = pnand %p2654_p1, %p3321_p3  ;;  %p2662_p10 = scmp.lt.s32.totalorder %s2660_s19, %s2653_s14 }
  0xb9   : > { %p2657_p6 = pneg %p2656_p5  ;;  %p2663_p11 = por %p2662_p10, %p2661_p13 }
  0xbb   : > { %p2664_p0 = pnand %p2663_p11, %p2657_p6 }
  0xbd   : > { %2667 = shalt.err (!%p2664_p0)
}
  0xbe   : > { %2376 = dma.hbm_to_vmem [thread:$0]  (!%p3939_p7), %s3377_s0, 16, %s3380_s30, %s3895_s1  }
  0xbf   : > { %s2668_s4 = scalar_lea.hbm %s3865_s15, 16  ;;  %p3942_p12 = scmp.ne.s32.totalorder %s3931_s8, 0 }
  0xc0   : > { %p2669_p8 = scmp.ne.s32.totalorder %s3865_s15, %s2668_s4  ;;  %p2675_p1 = scmp.lt.u32.totalorder %s2668_s4, %s3865_s15 }
  0xc1   : > { %p3943_p9 = pneg %p3942_p12 }
  0xc3   : > { %p2671_p2 = pnand %p2669_p8, %p3943_p9 }
  0xc5   : > { %p2672_p4 = pneg %p2671_p2 }
  0xc7   : > { %p2677_p5 = pnand %p2675_p1, %p2672_p4 }
  0xc9   : > { %2680 = shalt.err (!%p2677_p5)
}
  0xca   : > { %s2681_s0 = scalar_lea.vmem %s530_s29, 16  ;;  %p3944_p13 = pmov %p3943_p9 }
  0xcb   : > { %p2682_p6 = scmp.ne.s32.totalorder %s530_s29, %s2681_s0  ;;  %s2688_s30 = scalar_lea.vmem %s530_s29, 32 }
  0xcc   : > { %p2689_p0 = scmp.lt.s32.totalorder %s530_s29, %s530_s29  ;;  %p2690_p7 = scmp.lt.s32.totalorder %s2688_s30, %s2681_s0 }
  0xcd   : > { %p2684_p10 = pnand %p2682_p6, %p3944_p13 }
  0xce   : > { %p2691_p3 = por %p2690_p7, %p2689_p0 }
  0xcf   : > { %p2685_p11 = pneg %p2684_p10 }
  0xd1   : > { %p2692_p8 = pnand %p2691_p3, %p2685_p11 }
  0xd3   : > { %2695 = shalt.err (!%p2692_p8)
}
  0xd4   : > { %2357 = dma.hbm_to_vmem [thread:$0]  (!%p3942_p12), %s3865_s15, 16, %s530_s29, [#allocation21]  }
  0xd5   : > { %s3945_s3 = sld [smem:[#allocation51_spill]]  ;;  %s558_s23 = scalar_lea.vmem [#allocation5], %s3265_s22 }
  0xd6   : > { %s565_s8 = sshll.u32 %s558_s23, 4  ;;  %s3946_s6 = sld [smem:[#allocation54_spill]]  ;;  %s3436_s8 = int_to_ptr.vmem [resolvable:$true] %s565_s8 }
  0xd7   : > { %s556_s30 = scalar_lea.sflag [#allocation6], %s3265_s22  ;;  %p3947_p7 = scmp.ne.s32.totalorder %s3936_s21, 0 }
  0xdb   : > { %s3433_s16 = scalar_lea.hbm %s3945_s3, %s3268_s25  ;;  %s2701_s5 = scalar_lea.hbm %s3945_s3, 32 }
  0xdc   : > { %s3442_s0 = scalar_lea.hbm %s3946_s6, %s3268_s25  ;;  %s2696_s29 = scalar_lea.hbm %s3433_s16, 16 }
  0xdd   : > { %p2697_p3 = scmp.ne.s32.totalorder %s3433_s16, %s2696_s29  ;;  %p2702_p2 = scmp.lt.u32.totalorder %s3433_s16, %s3945_s3 }
  0xde   : > { %p2703_p4 = scmp.lt.u32.totalorder %s2701_s5, %s2696_s29  ;;  %p2705_p5 = scmp.lt.u32.totalorder %s2696_s29, %s3433_s16 }
  0xdf   : > { %p2699_p12 = pnand %p2697_p3, %p3947_p7 }
  0xe0   : > { %p2704_p1 = por %p2703_p4, %p2702_p2 }
  0xe1   : > { %p2700_p9 = pneg %p2699_p12 }
  0xe2   : > { %p2706_p6 = por %p2705_p5, %p2704_p1 }
  0xe4   : > { %p2707_p13 = pnand %p2706_p6, %p2700_p9 }
  0xe6   : > { %2710 = shalt.err (!%p2707_p13)
}
  0xe7   : > { %s2711_s23 = scalar_lea.vmem %s3436_s8, 16  ;;  %s3034_s14 = smov [#allocation5]  }
  0xe8   : > { %p2712_p10 = scmp.ne.s32.totalorder %s3436_s8, %s2711_s23  ;;  %s2716_s27 = sshll.u32 %s3034_s14, 4  ;;  %s2717_s27 = int_to_ptr.vmem [resolvable:$false] %s2716_s27 }
  0xe9   : > { %s2718_s1 = scalar_lea.vmem %s2717_s27, 32  ;;  %p2719_p8 = scmp.lt.s32.totalorder %s3436_s8, %s2717_s27 }
  0xea   : > { %p2714_p11 = pnand %p2712_p10, %p3947_p7  ;;  %p2720_p3 = scmp.lt.s32.totalorder %s2718_s1, %s2711_s23 }
  0xec   : > { %p2715_p0 = pneg %p2714_p11  ;;  %p2721_p12 = por %p2720_p3, %p2719_p8 }
  0xee   : > { %p2722_p2 = pnand %p2721_p12, %p2715_p0 }
  0xf0   : > { %2725 = shalt.err (!%p2722_p2)
}
  0xf1   : > { %p3948_p9 = scmp.ne.s32.totalorder %s3932_s17, 0  ;;  %s600_s29 = scalar_lea.vmem [#allocation10], %s3265_s22 }
  0xf2   : > { %s607_s19 = sshll.u32 %s600_s29, 4  ;;  %s3949_s9 = sld [smem:[#allocation57_spill]]  ;;  %s608_s19 = int_to_ptr.vmem [resolvable:$true] %s607_s19 }
  0xf3   : > { %2361 = dma.hbm_to_vmem [thread:$0]  (!%p3948_p9), %s3433_s16, 16, %s3436_s8, %s556_s30  }
  0xf4   : > { %s2726_s23 = scalar_lea.hbm %s3442_s0, 16  ;;  %s2731_s1 = scalar_lea.hbm %s3946_s6, 32 }
  0xf5   : > { %p2727_p4 = scmp.ne.s32.totalorder %s3442_s0, %s2726_s23  ;;  %p2732_p6 = scmp.lt.u32.totalorder %s3442_s0, %s3946_s6 }
  0xf6   : > { %p2733_p13 = scmp.lt.u32.totalorder %s2731_s1, %s2726_s23  ;;  %p2735_p11 = scmp.lt.u32.totalorder %s2726_s23, %s3442_s0 }
  0xf7   : > { %p2729_p1 = pnand %p2727_p4, %p3947_p7 }
  0xf8   : > { %s3471_s4 = scalar_lea.hbm %s3949_s9, %s3268_s25  ;;  %p2734_p10 = por %p2733_p13, %p2732_p6 }
  0xf9   : > { %p2730_p5 = pneg %p2729_p1 }
  0xfa   : > { %p2736_p0 = por %p2735_p11, %p2734_p10 }
  0xfc   : > { %p2737_p8 = pnand %p2736_p0, %p2730_p5 }
  0xfe   : > { %2740 = shalt.err (!%p2737_p8)
}
  0xff   : > { %s2741_s16 = scalar_lea.vmem %s608_s19, 16  ;;  %s3035_s8 = smov [#allocation10]  }
 0x100   : > { %p2742_p3 = scmp.ne.s32.totalorder %s608_s19, %s2741_s16  ;;  %s2746_s30 = sshll.u32 %s3035_s8, 4  ;;  %s2747_s30 = int_to_ptr.vmem [resolvable:$false] %s2746_s30 }
 0x101   : > { %s2748_s29 = scalar_lea.vmem %s2747_s30, 32  ;;  %p2749_p4 = scmp.lt.s32.totalorder %s608_s19, %s2747_s30 }
 0x102   : > { %p2744_p12 = pnand %p2742_p3, %p3947_p7  ;;  %p2750_p1 = scmp.lt.s32.totalorder %s2748_s29, %s2741_s16 }
 0x104   : > { %p2745_p2 = pneg %p2744_p12  ;;  %p2751_p9 = por %p2750_p1, %p2749_p4 }
 0x106   : > { %p2752_p6 = pnand %p2751_p9, %p2745_p2 }
 0x108   : > { %2755 = shalt.err (!%p2752_p6)
}
 0x109   : > { %p3950_p13 = scmp.ne.s32.totalorder %s3932_s17, 0  ;;  %s3951_s3 = scalar_lea.sflag [#allocation9], %s3283_s2 }
 0x10a   : > { %s642_s11 = scalar_lea.vmem [#allocation13], %s3265_s22  ;;  %s3952_s12 = sld [smem:[#allocation60_spill]] }
 0x10b   : > { %2367 = dma.hbm_to_vmem [thread:$0]  (!%p3950_p13), %s3442_s0, 16, %s608_s19, %s3951_s3  }
 0x10c   : > { %s649_s7 = sshll.u32 %s642_s11, 4  ;;  %s2756_s27 = scalar_lea.hbm %s3471_s4, 16  ;;  %s650_s7 = int_to_ptr.vmem [resolvable:$true] %s649_s7 }
 0x10d   : > { %p2757_p9 = scmp.ne.s32.totalorder %s3471_s4, %s2756_s27  ;;  %s2761_s8 = scalar_lea.hbm %s3949_s9, 32 }
 0x10e   : > { %p2762_p11 = scmp.lt.u32.totalorder %s3471_s4, %s3949_s9  ;;  %p2763_p0 = scmp.lt.u32.totalorder %s2761_s8, %s2756_s27 }
 0x10f   : > { %p2759_p5 = pnand %p2757_p9, %p3947_p7  ;;  %p2765_p3 = scmp.lt.u32.totalorder %s2756_s27, %s3471_s4 }
 0x110   : > { %s3497_s14 = scalar_lea.hbm %s3952_s12, %s3268_s25  ;;  %p2764_p8 = por %p2763_p0, %p2762_p11 }
 0x111   : > { %p2760_p10 = pneg %p2759_p5 }
 0x112   : > { %p2766_p12 = por %p2765_p3, %p2764_p8 }
 0x114   : > { %p2767_p2 = pnand %p2766_p12, %p2760_p10 }
 0x116   : > { %2770 = shalt.err (!%p2767_p2)
}
 0x117   : > { %s2771_s0 = scalar_lea.vmem %s650_s7, 16  ;;  %s3036_s19 = smov [#allocation13]  }
 0x118   : > { %p2772_p4 = scmp.ne.s32.totalorder %s650_s7, %s2771_s0  ;;  %s2776_s3 = sshll.u32 %s3036_s19, 4  ;;  %s2777_s3 = int_to_ptr.vmem [resolvable:$false] %s2776_s3 }
 0x119   : > { %s2778_s11 = scalar_lea.vmem %s2777_s3, 32  ;;  %p2779_p9 = scmp.lt.s32.totalorder %s650_s7, %s2777_s3 }
 0x11a   : > { %p2774_p1 = pnand %p2772_p4, %p3947_p7  ;;  %p2780_p5 = scmp.lt.s32.totalorder %s2778_s11, %s2771_s0 }
 0x11c   : > { %p2775_p6 = pneg %p2774_p1  ;;  %p2781_p13 = por %p2780_p5, %p2779_p9 }
 0x11e   : > { %p2782_p0 = pnand %p2781_p13, %p2775_p6 }
 0x120   : > { %2785 = shalt.err (!%p2782_p0)
}
 0x121   : > { %p3953_p11 = scmp.ne.s32.totalorder %s3932_s17, 0  ;;  %s3954_s5 = scalar_lea.sflag [#allocation12], %s3283_s2 }
 0x122   : > { %s684_s23 = scalar_lea.vmem [#allocation16], %s3265_s22  ;;  %s2786_s1 = scalar_lea.hbm %s3497_s14, 16 }
 0x123   : > { %2373 = dma.hbm_to_vmem [thread:$0]  (!%p3953_p11), %s3471_s4, 16, %s650_s7, %s3954_s5  }
 0x124   : > { %s691_s27 = sshll.u32 %s684_s23, 4  ;;  %p2787_p10 = scmp.ne.s32.totalorder %s3497_s14, %s2786_s1  ;;  %s692_s27 = int_to_ptr.vmem [resolvable:$true] %s691_s27 }
 0x125   : > { %s2791_s30 = scalar_lea.hbm %s3952_s12, 32  ;;  %p2792_p3 = scmp.lt.u32.totalorder %s3497_s14, %s3952_s12 }
 0x126   : > { %p2789_p13 = pnand %p2787_p10, %p3947_p7  ;;  %p2793_p12 = scmp.lt.u32.totalorder %s2791_s30, %s2786_s1 }
 0x127   : > { %p2795_p4 = scmp.lt.u32.totalorder %s2786_s1, %s3497_s14 }
 0x128   : > { %p2790_p8 = pneg %p2789_p13  ;;  %p2794_p2 = por %p2793_p12, %p2792_p3 }
 0x12a   : > { %p2796_p1 = por %p2795_p4, %p2794_p2 }
 0x12c   : > { %p2797_p6 = pnand %p2796_p1, %p2790_p8 }
 0x12e   : > { %2800 = shalt.err (!%p2797_p6)
}
 0x12f   : > { %s2801_s4 = scalar_lea.vmem %s692_s27, 16  ;;  %s3037_s7 = smov [#allocation16]  }
 0x130   : > { %p2802_p9 = scmp.ne.s32.totalorder %s692_s27, %s2801_s4  ;;  %s2806_s19 = sshll.u32 %s3037_s7, 4  ;;  %s2807_s19 = int_to_ptr.vmem [resolvable:$false] %s2806_s19 }
 0x131   : > { %s2808_s3 = scalar_lea.vmem %s2807_s19, 32  ;;  %p2809_p10 = scmp.lt.s32.totalorder %s692_s27, %s2807_s19 }
 0x132   : > { %p2804_p5 = pnand %p2802_p9, %p3947_p7  ;;  %p2810_p13 = scmp.lt.s32.totalorder %s2808_s3, %s2801_s4 }
 0x134   : > { %p2805_p0 = pneg %p2804_p5  ;;  %p2811_p11 = por %p2810_p13, %p2809_p10 }
 0x136   : > { %p2812_p3 = pnand %p2811_p11, %p2805_p0 }
 0x138   : > { %2815 = shalt.err (!%p2812_p3)
}
 0x139   : > { %p3955_p12 = scmp.ne.s32.totalorder %s3932_s17, 0  ;;  %s3956_s11 = scalar_lea.sflag [#allocation15], %s3283_s2 }
 0x13a   : > { %s3542_s1 = scalar_lea.hbm %s3863_s13, %s3268_s25  ;;  %s701_s16 = scalar_lea.vmem [#allocation17], %s3265_s22 }
 0x13b   : > { %2379 = dma.hbm_to_vmem [thread:$0]  (!%p3955_p12), %s3497_s14, 16, %s692_s27, %s3956_s11  }
 0x13c   : > { %s708_s8 = sshll.u32 %s701_s16, 4  ;;  %s699_s30 = scalar_lea.sflag [#allocation18], %s3283_s2  ;;  %s709_s8 = int_to_ptr.vmem [resolvable:$true] %s708_s8 }
 0x13d   : > { %s2816_s29 = scalar_lea.hbm %s3542_s1, 16  ;;  %s2821_s27 = scalar_lea.hbm %s3863_s13, 32 }
 0x13e   : > { %p2817_p11 = scmp.ne.s32.totalorder %s3542_s1, %s2816_s29  ;;  %p2822_p4 = scmp.lt.u32.totalorder %s3542_s1, %s3863_s13 }
 0x13f   : > { %p2823_p1 = scmp.lt.u32.totalorder %s2821_s27, %s2816_s29  ;;  %p2825_p9 = scmp.lt.u32.totalorder %s2816_s29, %s3542_s1 }
 0x140   : > { %p2819_p8 = pnand %p2817_p11, %p3947_p7 }
 0x141   : > { %p2824_p6 = por %p2823_p1, %p2822_p4 }
 0x142   : > { %p2820_p2 = pneg %p2819_p8 }
 0x143   : > { %p2826_p5 = por %p2825_p9, %p2824_p6 }
 0x145   : > { %p2827_p0 = pnand %p2826_p5, %p2820_p2 }
 0x147   : > { %2830 = shalt.err (!%p2827_p0)
}
 0x148   : > { %s2831_s22 = scalar_lea.vmem %s709_s8, 16  ;;  %s3038_s2 = smov [#allocation17]  }
 0x149   : > { %p2832_p10 = scmp.ne.s32.totalorder %s709_s8, %s2831_s22  ;;  %s2836_s7 = sshll.u32 %s3038_s2, 4  ;;  %s2837_s7 = int_to_ptr.vmem [resolvable:$false] %s2836_s7 }
 0x14a   : > { %s2838_s19 = scalar_lea.vmem %s2837_s7, 32  ;;  %p2839_p11 = scmp.lt.s32.totalorder %s709_s8, %s2837_s7 }
 0x14b   : > { %p2834_p13 = pnand %p2832_p10, %p3947_p7  ;;  %p2840_p8 = scmp.lt.s32.totalorder %s2838_s19, %s2831_s22 }
 0x14d   : > { %p2835_p3 = pneg %p2834_p13  ;;  %p2841_p12 = por %p2840_p8, %p2839_p11 }
 0x14f   : > { %p2842_p1 = pnand %p2841_p12, %p2835_p3 }
 0x151   : > { %2845 = shalt.err (!%p2842_p1)
}
 0x152   : > { %p3957_p4 = scmp.ne.s32.totalorder %s3932_s17, 0  ;;  %p3958_p2 = scmp.ne.s32.totalorder %s3930_s28, 0 }
 0x153   : > { %s3566_s21 = sand.u32 (!%p3958_p2), 1, %s3002_s18   ;;  %p3959_p7 = scmp.ne.s32.totalorder (!%p3958_p2), %s3924_s26, 0 }
 0x154   : > { %2382 = dma.hbm_to_vmem [thread:$0]  (!%p3957_p4), %s3542_s1, 16, %s709_s8, %s699_s30  }
 0x155   : > { %717 = sbr.rel (%p3958_p2) target bundleno = 3151 (0xc4f), region = 80  ;;  %s720_s3 = scalar_lea.sflag (!%p3958_p2), [#allocation6], %s3566_s21 }
 0x15c   : > { %2949 = dma.done.wait (%p3959_p7), %s720_s3, 16  }
 0x15d   : > { %2951 = vsyncadd (%p3959_p7), %s720_s3, 4294967280  ;;  %s727_s17 = sand.u32 1, %s3205_s24  }
 0x15e   : > { %s728_s5 = scalar_lea.sflag [#allocation9], %s727_s17 }
 0x15f   : > { %2953 = dma.done.wait (%p3959_p7), %s728_s5, 32  }
 0x160   : > { %2955 = vsyncadd (%p3959_p7), %s728_s5, 4294967264  ;;  %s744_s1 = scalar_lea.sflag [#allocation12], %s727_s17 }
 0x161   : > { %2957 = dma.done.wait (%p3959_p7), %s744_s1, 32  }
 0x162   : > { %2959 = vsyncadd (%p3959_p7), %s744_s1, 4294967264  ;;  %s760_s30 = scalar_lea.sflag [#allocation15], %s727_s17 }
 0x163   : > { %2961 = dma.done.wait (%p3959_p7), %s760_s30, 32  }
 0x164   : > { %2963 = vsyncadd (%p3959_p7), %s760_s30, 4294967264  ;;  %s776_s14 = scalar_lea.sflag [#allocation18], %s727_s17 }
 0x165   : > { %2965 = dma.done.wait (%p3959_p7), %s776_s14, 16  }
 0x166   : > { %2967 = vsyncadd (%p3959_p7), %s776_s14, 4294967280  ;;  %p3960_p12 = scmp.eq.s32.totalorder %s3205_s24, 0 }
 0x168   : > { %2969 = dma.done.wait (%p3960_p12), [#allocation18], 16   ;;  %p3961_p6 = pmov %p3960_p12 }
 0x16a   : > { %2971 = vsyncadd (%p3961_p6), [#allocation18], 4294967280  ;;  %p3962_p9 = pmov %p3961_p6 }
 0x16b   : > { %p3963_p5 = pmov %p3961_p6 }
 0x16c   : > { %2973 = dma.done.wait (%p3962_p9), [#allocation21], 16  }
 0x16d   : > { %2975 = vsyncadd (%p3963_p5), [#allocation21], 4294967280  ;;  %s3964_s4 = sld [smem:[#allocation38_spill]]  ;;  %s3607_s25 = sand.u32 1, %s2990_s10  }
 0x16e   : > { %p890_p0 = scmp.lt.s32.totalorder %s3014_s20, 1  ;;  %s2155_s26 = sshll.u32 %s3607_s25, 3 }
 0x16f   : > { %s3965_s17 = sld [smem:[#allocation49_spill]]  ;;  %s3966_s14 = sld [smem:[#allocation50_spill]] }
 0x170   : > { %s891_s22 = scalar_select %p890_p0, %s3014_s20, 1 }
 0x171   : > { %s3967_s8 = sld [smem:[#allocation52_spill]]  ;;  %s3968_s11 = sld [smem:[#allocation56_spill]] }
 0x172   : > { %s2156_s7 = sshll.u32 %s891_s22, 3  ;;  %s3969_s19 = sld [smem:[#allocation58_spill]] }
 0x173   : > { %p894_p10 = scmp.lt.s32.totalorder %s3964_s4, 1  ;;  %s3635_s3 = scalar_lea.vmem [#allocation22], %s2155_s26 }
 0x174   : > { %p2165_p13 = scmp.ne.s32.totalorder %s3964_s4, 0 }
 0x175   : > { %s895_s2 = scalar_select %p894_p10, %s3964_s4, 1 }
 0x176   : > { %s893_s24 = scalar_lea.vmem %s3965_s17, %s2156_s7  ;;  %s889_s17 = scalar_lea.vmem [#allocation23], %s3607_s25  ;;  %vm920_vm0 = vcmask (!%p2165_p13), 261120  }
 0x177   : > { %s2205_s5 = sshll.u32 %s895_s2, 4  ;;  %s2208_s22 = sshll.u32 %s895_s2, 5  ;;  %v919_v0 = vld [vmem:[%s893_s24] sm:$0xff] (!%p2165_p13) }
 0x178   : > { %s898_s27 = scalar_lea.vmem %s3966_s14, %s2205_s5  ;;  %s3623_s16 = scalar_lea.vmem %s3967_s8, %s2205_s5  ;;  %921 = vst.msk [vmem:[#allocation2] sm:$0xff] (!%p2165_p13), %vm920_vm0, %v919_v0 }
 0x179   : > { %s3628_s6 = scalar_lea.vmem %s3968_s11, %s2205_s5  ;;  %s3633_s7 = scalar_lea.vmem %s3969_s19, %s2208_s22 }
 0x17a   : > { %918 = sbr.rel (%p2165_p13) target bundleno = 385 (0x181), region = 124 }
 0x181 PF: > { %v2504_v1 = vld [vmem:[%s898_s27] sm:$0xff]   ;;  %v3039_v2 = vmov 0.0   ;;  %v2505_v3 = vld [vmem:[%s898_s27 + $0x8] sm:$0xff]   ;;  %vm3040_vm1 = vmmov 0   ;;  %vm970_vm2 = vcmask 261120   ;;  %s3970_s9 = scalar_lea.vmem [#allocation5], %s3566_s21 }
 0x182   : > { %2239 = vmatprep.subr.bf16.mxu0 %v3039_v2  ;;  %2247 = vmatprep.subr.bf16.mxu1 %v3039_v2  ;;  %v3643_v4 = vld [vmem:[#allocation2] sm:$0xff]  ;;  %s3041_s12 = smov 96   ;;  %s3042_s11 = smov 120   ;;  %vm1020_vm3 = vcmask 64512   ;;  %vm1083_vm4 = vcmask 1043456   ;;  %vm1472_vm5 = vcmask 130048  }
 0x183   : > { %2240 = vmatpush3.bf16.msra.mxu0 %v2504_v1  ;;  %2243 = vmatprep.mubr.msk.bf16.mxu0 %vm3040_vm1, %v3039_v2  ;;  %v951_v5 = vpack.c.bf16 %v3643_v4, %v3643_v4  ;;  %v2166_v6 = vld [vmem:[%s3970_s9] ss:$0 sm:$0xff]  ;;  %s3043_s28 = smov 88   ;;  %s3044_s23 = smov 80   ;;  %vm1474_vm6 = vcmask 195584   ;;  %vm1661_vm7 = vcmask 523264  }
 0x184   : > { %2241 = vmatprep.subr.bf16.mxu0 %v3039_v2  ;;  %2249 = vmatprep.mubr.msk.bf16.mxu1 %vm3040_vm1, %v3039_v2  ;;  %s3045_s8 = smov 112   ;;  %s3046_s29 = smov 72  }
 0x185   : > { %s3047_s0 = smov 104   ;;  %s3048_s27 = smov 56  }
 0x186   : > { %s3049_s4 = smov 64   ;;  %s3050_s26 = smov 40  }
 0x187   : > { %2242 = vmatpush3.bf16.msra.mxu0 %v2505_v3  ;;  %s3051_s2 = smov 48   ;;  %s3052_s24 = smov 8  }
 0x188   : > { %2253 = vmatprep.subr.bf16.mxu0 %v3039_v2  ;;  %s3053_s5 = smov 16   ;;  %s3054_s1 = smov 24  }
 0x189   : > { %s3972_s30 = scalar_lea.vmem [#allocation10], %s3566_s21  ;;  %s3974_s14 = scalar_lea.vmem [#allocation13], %s3566_s21 }
 0x18a   : > { %2244 = vmatmul.mubr.msk.bf16.vlgmr.msra.gmra.mrb[0].mxu0 %vm970_vm2, %v951_v5  ;;  %s3975_s22 = scalar_lea.vmem [#allocation14], %s3566_s21  ;;  %s3976_s19 = scalar_lea.vmem [#allocation16], %s3566_s21 }
 0x18b   : > { %2255 = vmatprep.mubr.msk.bf16.mxu0 %vm3040_vm1, %v3039_v2  ;;  %s3978_s9 = sld [smem:[#allocation38_spill]] }
 0x191   : > { %p2196_p3 = scmp.ne.s32.totalorder %s3978_s9, 1 }
 0x192   : > { %vm1789_vm9 = vcmask (!%p2196_p3), 253952  }
 0x25d   : > { %v1008_v7 = vpop.f32.mrb[0].mxu0 }
 0x25e   : > { %v1009_v8 = vadd.f32 %v2166_v6, %v1008_v7  ;;  %v2245_v9 = vpop.f32.mrb[1].mxu0 }
 0x25f   : > { %v1011_v10 = vpop.f32.mrb[2].mxu0 }
 0x260   : > { %v1014_v11 = vmul.f32 0.35355338, %v1009_v8  ;;  %v3656_v12 = vpack.c.bf16 %v1009_v8, %v1009_v8  ;;  %v2246_v13 = vpop.f32.mrb[3].mxu0 }
 0x262   : > { %v1015_v14 = vpack.c.bf16 %v1014_v11, %v1014_v11  ;;  %1018 = vrot.lane.b32.xlu0 %v3656_v12, %s3041_s12 }
 0x264   : > { %1129 = vrot.lane.b32.xlu1 %v1015_v14, %s3042_s11 }
 0x266   : > { %1131 = vrot.lane.b32.xlu0 %v3656_v12, %s3043_s28 }
 0x268   : > { %1241 = vrot.lane.b32.xlu1 %v3656_v12, %s3044_s23 }
 0x26a   : > { %1239 = vrot.lane.b32.xlu0 %v1015_v14, %s3045_s8 }
 0x26c   : > { %1351 = vrot.lane.b32.xlu1 %v3656_v12, %s3046_s29 }
 0x26e   : > { %1349 = vrot.lane.b32.xlu0 %v1015_v14, %s3047_s0 }
 0x2d4   : > { %v1019_v15 = vpop.permute.xlu0 %1018 }
 0x2d5   : > { %v1025_v16 = vsel %vm1020_vm3, %v1019_v15, 0 }
 0x2d6   : > { %2248 = vmatpush3.bf16.xpose.msra.mxu1 %v1025_v16  ;;  %v1130_v18 = vpop.permute.xlu1 %1129 }
 0x2d7   : > { %2259 = vmatprep.subr.bf16.mxu1 %v3039_v2 }
 0x2d8   : > { %v1132_v17 = vpop.permute.xlu0 %1131 }
 0x2d9   : > { %v1137_v19 = vsel %vm1020_vm3, %v1132_v17, 0 }
 0x2da   : > { %v1242_v20 = vpop.permute.xlu1 %1241 }
 0x2db   : > { %v1247_v21 = vsel %vm1020_vm3, %v1242_v20, 0 }
 0x2dc   : > { %v1240_v23 = vpop.permute.xlu0 %1239 }
 0x2dd   : > { %2250 = vmatmul.mubr.msk.bf16.vlgmr.msra.gmra.mrb[0].mxu1 %vm1020_vm3, %v1015_v14 }
 0x2de   : > { %2260 = vmatpush3.bf16.xpose.msra.mxu1 %v1137_v19  ;;  %2261 = vmatprep.mubr.msk.bf16.mxu1 %vm3040_vm1, %v3039_v2  ;;  %v1352_v22 = vpop.permute.xlu1 %1351 }
 0x2df   : > { %2271 = vmatprep.subr.bf16.mxu1 %v3039_v2  ;;  %v1357_v24 = vsel %vm1020_vm3, %v1352_v22, 0 }
 0x2e0   : > { %v1350_v25 = vpop.permute.xlu0 %1349 }
 0x2e5   : > { %2262 = vmatmul.mubr.msk.bf16.vlgmr.msra.gmra.mrb[4].mxu1 %vm1020_vm3, %v1130_v18 }
 0x2e6   : > { %2272 = vmatpush3.bf16.xpose.msra.mxu1 %v1247_v21  ;;  %2273 = vmatprep.mubr.msk.bf16.mxu1 %vm3040_vm1, %v3039_v2 }
 0x2e7   : > { %2283 = vmatprep.subr.bf16.mxu1 %v3039_v2 }
 0x2ed   : > { %2274 = vmatmul.mubr.msk.bf16.vlgmr.msra.gmra.mrb[8].mxu1 %vm1020_vm3, %v1240_v23 }
 0x2ee   : > { %2284 = vmatpush3.bf16.xpose.msra.mxu1 %v1357_v24  ;;  %2285 = vmatprep.mubr.msk.bf16.mxu1 %vm3040_vm1, %v3039_v2 }
 0x2ef   : > { %2295 = vmatprep.subr.bf16.mxu1 %v3039_v2 }
 0x2f5   : > { %2286 = vmatmul.mubr.msk.bf16.vlgmr.msra.gmra.mrb[12].mxu1 %vm1020_vm3, %v1350_v25 }
 0x2f6   : > { %2299 = vmatprep.mubr.msk.bf16.mxu1 %vm3040_vm1, %v3039_v2 }
 0x3b0   : > { %v1061_v26 = vpop.f32.mrb[0].mxu1 }
 0x3b1   : > { %v2251_v27 = vpop.f32.mrb[1].mxu1  ;;  %v1067_v28 = vsel %vm1020_vm3, %v1061_v26, -inf }
 0x3b2   : > { %1068 = vmax.xlane.f32.xlu1 %v1067_v28  ;;  %v1064_v29 = vpop.f32.mrb[2].mxu1  ;;  %v2506_v28 = vld [vmem:[%s3623_s16] sm:$0xff]  }
 0x3b3   : > { %v2252_v30 = vpop.f32.mrb[3].mxu1  ;;  %2296 = vmatpush3.bf16.msra.mxu1 %v2506_v28 }
 0x3b4   : > { %2297 = vmatprep.subr.bf16.mxu1 %v3039_v2  ;;  %v2507_v30 = vld [vmem:[%s3623_s16 + $0x8] sm:$0xff]   ;;  %s3971_s16 = scalar_lea.vmem [#allocation8], %s3566_s21 }
 0x3b7   : > { %2298 = vmatpush3.bf16.msra.mxu1 %v2507_v30 }
 0x3b8   : > { %v1173_v31 = vpop.f32.mrb[4].mxu1  ;;  %2311 = vmatprep.subr.bf16.mxu1 %v3039_v2 }
 0x3b9   : > { %v2263_v32 = vpop.f32.mrb[5].mxu1  ;;  %v1179_v33 = vsel %vm1020_vm3, %v1173_v31, -inf }
 0x3ba   : > { %1180 = vmax.xlane.f32.xlu0 %v1179_v33  ;;  %v1176_v34 = vpop.f32.mrb[6].mxu1 }
 0x3bb   : > { %v2264_v35 = vpop.f32.mrb[7].mxu1 }
 0x3c0   : > { %v1283_v36 = vpop.f32.mrb[8].mxu1 }
 0x3c1   : > { %v2275_v37 = vpop.f32.mrb[9].mxu1  ;;  %v1289_v38 = vsel %vm1020_vm3, %v1283_v36, -inf }
 0x3c2   : > { %1290 = vmax.xlane.f32.xlu0 %v1289_v38  ;;  %v1286_v39 = vpop.f32.mrb[10].mxu1 }
 0x3c3   : > { %1190 = vrot.lane.b32.xlu1 %v3656_v12, %s3048_s27  ;;  %v2276_v40 = vpop.f32.mrb[11].mxu1 }
 0x3c8   : > { %v1393_v41 = vpop.f32.mrb[12].mxu1 }
 0x3c9   : > { %v2287_v42 = vpop.f32.mrb[13].mxu1  ;;  %v1399_v45 = vsel %vm1020_vm3, %v1393_v41, -inf }
 0x3ca   : > { %v1396_v43 = vpop.f32.mrb[14].mxu1 }
 0x3cb   : > { %v2288_v44 = vpop.f32.mrb[15].mxu1 }
 0x3d8   : > { %1078 = vrot.lane.b32.xlu0 %v3656_v12, %s3049_s4 }
 0x3dc   : > { %1410 = vrot.lane.b32.xlu0 %v3656_v12, %s3050_s26 }
 0x3e7   : > { %1400 = vmax.xlane.f32.xlu1 %v1399_v45 }
 0x3f8   : > { %1300 = vrot.lane.b32.xlu1 %v3656_v12, %s3051_s2 }
 0x43f   : > { %v1069_v46 = vpop.xlane.xlu1 %1068 }
 0x440   : > { %v1070_v47 = vsub.f32 %v1061_v26, %v1069_v46 }
 0x442   : > { %v1071_v48 = vmul.f32 1.442695, %v1070_v47 }
 0x443   : > { %v1191_v58 = vpop.permute.xlu1 %1190 }
 0x444   : > { %2514 = vpow2.f32 %v1071_v48  ;;  %v1196_v62 = vsel %vm1083_vm4, %v1191_v58, 0 }
 0x447   : > { %v1181_v49 = vpop.xlane.xlu0 %1180 }
 0x448   : > { %v1182_v50 = vsub.f32 %v1173_v31, %v1181_v49 }
 0x44a   : > { %v1183_v51 = vmul.f32 1.442695, %v1182_v50 }
 0x44c   : > { %2516 = vpow2.f32 %v1183_v51 }
 0x44e   : > { %v2515_v55 = vpop.eup %2514 }
 0x44f   : > { %v1291_v52 = vpop.xlane.xlu0 %1290  ;;  %v1077_v60 = vpack.c.bf16 %v2515_v55, %v2515_v55  ;;  %v1073_v63 = vsel %vm1020_vm3, %v2515_v55, 0.0 }
 0x450   : > { %v1292_v53 = vsub.f32 %v1283_v36, %v1291_v52 }
 0x452   : > { %v1293_v54 = vmul.f32 1.442695, %v1292_v53  ;;  %v2178_v53 = vld [vmem:[%s3971_s16] ss:$0 sm:$0xff] }
 0x453   : > { %v1079_v56 = vpop.permute.xlu0 %1078 }
 0x454   : > { %2518 = vpow2.f32 %v1293_v54  ;;  %v1085_v57 = vsel %vm1083_vm4, %v1079_v56, 0 }
 0x455   : > { %2254 = vmatpush3.bf16.msra.mxu0 %v1085_v57 }
 0x456   : > { %v2517_v59 = vpop.eup %2516  ;;  %2265 = vmatprep.subr.bf16.mxu0 %v3039_v2 }
 0x457   : > { %v1185_v61 = vsel %vm1020_vm3, %v2517_v59, 0.0  ;;  %v1189_v1 = vpack.c.bf16 %v2517_v59, %v2517_v59  ;;  %v1411_v10 = vpop.permute.xlu0 %1410 }
 0x458   : > { %2256 = vmatmul.mubr.msk.bf16.vlgmr.msra.gmra.mrb[4].mxu0 %vm1020_vm3, %v1077_v60  ;;  %1186 = vadd.xlane.f32.xlu1 %v1185_v61  ;;  %v1416_v12 = vsel %vm1083_vm4, %v1411_v10, 0 }
 0x459   : > { %2266 = vmatpush3.bf16.msra.mxu0 %v1196_v62  ;;  %2267 = vmatprep.mubr.msk.bf16.mxu0 %vm3040_vm1, %v3039_v2 }
 0x45a   : > { %2277 = vmatprep.subr.bf16.mxu0 %v3039_v2 }
 0x45c   : > { %1074 = vadd.xlane.f32.xlu1 %v1073_v63 }
 0x45e   : > { %v2519_v0 = vpop.eup %2518 }
 0x45f   : > { %v1295_v3 = vsel %vm1020_vm3, %v2519_v0, 0.0  ;;  %v1299_v11 = vpack.c.bf16 %v2519_v0, %v2519_v0 }
 0x460   : > { %1296 = vadd.xlane.f32.xlu0 %v1295_v3  ;;  %2268 = vmatmul.mubr.msk.bf16.vlgmr.msra.gmra.mrb[8].mxu0 %vm1020_vm3, %v1189_v1  ;;  %v2508_v3 = vld [vmem:[%s3628_s6] sm:$0xff]  }
 0x461   : > { %2279 = vmatprep.mubr.msk.bf16.mxu0 %vm3040_vm1, %v3039_v2 }
 0x474   : > { %v1401_v5 = vpop.xlane.xlu1 %1400 }
 0x475   : > { %v1402_v6 = vsub.f32 %v1393_v41, %v1401_v5  ;;  %v2509_v5 = vld [vmem:[%s3628_s6 + $0x8] sm:$0xff]   ;;  %s3973_s6 = scalar_lea.vmem [#allocation11], %s3566_s21 }
 0x477   : > { %v1403_v7 = vmul.f32 1.442695, %v1402_v6  ;;  %v2511_v6 = vld [vmem:[%s3633_s7 + $0x8] sm:$0xff]  }
 0x478   : > { %v1301_v8 = vpop.permute.xlu1 %1300 }
 0x479   : > { %2520 = vpow2.f32 %v1403_v7  ;;  %v1306_v9 = vsel %vm1083_vm4, %v1301_v8, 0 }
 0x47a   : > { %2278 = vmatpush3.bf16.msra.mxu0 %v1306_v9 }
 0x47b   : > { %2289 = vmatprep.subr.bf16.mxu0 %v3039_v2 }
 0x47d   : > { %2280 = vmatmul.mubr.msk.bf16.vlgmr.msra.gmra.mrb[12].mxu0 %vm1020_vm3, %v1299_v11  ;;  %v2182_v11 = vld [vmem:[%s3972_s30] ss:$0 sm:$0xff] }
 0x47e   : > { %2290 = vmatpush3.bf16.msra.mxu0 %v1416_v12  ;;  %2291 = vmatprep.mubr.msk.bf16.mxu0 %vm3040_vm1, %v3039_v2 }
 0x47f   : > { %2303 = vmatprep.subr.bf16.mxu0 %v3039_v2 }
 0x483   : > { %v2521_v13 = vpop.eup %2520 }
 0x484   : > { %v1405_v14 = vsel %vm1020_vm3, %v2521_v13, 0.0  ;;  %v1409_v15 = vpack.c.bf16 %v2521_v13, %v2521_v13  ;;  %v2183_v13 = vld [vmem:[%s3973_s6] ss:$0 sm:$0xff] }
 0x485   : > { %1406 = vadd.xlane.f32.xlu0 %v1405_v14 }
 0x486   : > { %2292 = vmatmul.mubr.msk.bf16.vlgmr.msra.gmra.mrb[16].mxu0 %vm1020_vm3, %v1409_v15 }
 0x487   : > { %2307 = vmatprep.mubr.msk.bf16.mxu0 %vm3040_vm1, %v3039_v2  ;;  %2304 = vmatpush3.bf16.msra.mxu0 %v2508_v3 }
 0x488   : > { %2305 = vmatprep.subr.bf16.mxu0 %v3039_v2 }
 0x48b   : > { %2306 = vmatpush3.bf16.msra.mxu0 %v2509_v5 }
 0x4e5   : > { %v1187_v16 = vpop.xlane.xlu1 %1186 }
 0x4e6   : > { %2522 = vrcp.f32 %v1187_v16 }
 0x4e9   : > { %v1075_v43 = vpop.xlane.xlu1 %1074 }
 0x4ed   : > { %v1297_v27 = vpop.xlane.xlu0 %1296 }
 0x4ee   : > { %2524 = vrcp.f32 %v1297_v27  ;;  %v2188_v27 = vld [vmem:[%s3975_s22] ss:$0 sm:$0xff] }
 0x4f0   : > { %v2523_v21 = vpop.eup %2522 }
 0x4f8   : > { %v2525_v31 = vpop.eup %2524 }
 0x512   : > { %v1407_v29 = vpop.xlane.xlu0 %1406 }
 0x513   : > { %2526 = vrcp.f32 %v1407_v29 }
 0x514   : > { %2528 = vrcp.f32 %v1075_v43  ;;  %v2194_v43 = vld [vmem:[%s3976_s19] ss:$0 sm:$0xff] }
 0x51d   : > { %v2527_v37 = vpop.eup %2526 }
 0x51e   : > { %v2529_v44 = vpop.eup %2528 }
 0x52b   : > { %v1121_v17 = vpop.f32.mrb[4].mxu0 }
 0x52c   : > { %v2257_v18 = vpop.f32.mrb[5].mxu0  ;;  %v1127_v47 = vmul.f32 %v2529_v44, %v1121_v17  ;;  %v2512_v17 = vld [vmem:[%s3633_s7 + $0x10] sm:$0xff]  }
 0x52d   : > { %v1124_v19 = vpop.f32.mrb[6].mxu0  ;;  %v2513_v18 = vld [vmem:[%s3633_s7 + $0x18] sm:$0xff]  }
 0x52e   : > { %v2258_v20 = vpop.f32.mrb[7].mxu0  ;;  %v2184_v19 = vld [vmem:[%s3974_s14] ss:$0 sm:$0xff] }
 0x533   : > { %v1232_v22 = vpop.f32.mrb[8].mxu0 }
 0x534   : > { %v1238_v23 = vmul.f32 %v2523_v21, %v1232_v22  ;;  %v2269_v24 = vpop.f32.mrb[9].mxu0 }
 0x535   : > { %v1235_v25 = vpop.f32.mrb[10].mxu0 }
 0x536   : > { %1460 = vrot.lane.b32.xlu0 %v1238_v23, %s3052_s24  ;;  %v2270_v26 = vpop.f32.mrb[11].mxu0 }
 0x550   : > { %v1342_v32 = vpop.f32.mrb[12].mxu0 }
 0x551   : > { %v1348_v33 = vmul.f32 %v2525_v31, %v1342_v32  ;;  %v2281_v34 = vpop.f32.mrb[13].mxu0 }
 0x552   : > { %v1345_v35 = vpop.f32.mrb[14].mxu0 }
 0x553   : > { %1464 = vrot.lane.b32.xlu1 %v1348_v33, %s3053_s5  ;;  %v2282_v36 = vpop.f32.mrb[15].mxu0 }
 0x559   : > { %v1452_v38 = vpop.f32.mrb[16].mxu0 }
 0x55a   : > { %v1458_v39 = vmul.f32 %v2527_v37, %v1452_v38  ;;  %v2293_v40 = vpop.f32.mrb[17].mxu0 }
 0x55b   : > { %v1455_v41 = vpop.f32.mrb[18].mxu0 }
 0x55c   : > { %1468 = vrot.lane.b32.xlu1 %v1458_v39, %s3054_s1  ;;  %v2294_v42 = vpop.f32.mrb[19].mxu0 }
 0x5a8   : > { %v1461_v45 = vpop.permute.xlu0 %1460 }
 0x5a9   : > { %v1471_v48 = vsel %vm1020_vm3, %v1127_v47, %v1461_v45 }
 0x5c5   : > { %v1465_v46 = vpop.permute.xlu1 %1464 }
 0x5c6   : > { %v1473_v49 = vsel %vm1472_vm5, %v1471_v48, %v1465_v46 }
 0x5ce   : > { %v1469_v50 = vpop.permute.xlu1 %1468 }
 0x5cf   : > { %v1475_v51 = vsel %vm1474_vm6, %v1473_v49, %v1469_v50 }
 0x5d0   : > { %v1476_v52 = vpack.c.bf16 %v1475_v51, %v1475_v51 }
 0x5d2   : > { %2300 = vmatmul.mubr.msk.bf16.vlgmr.msra.gmra.mrb[16].mxu1 %vm970_vm2, %v1476_v52 }
 0x5d3   : > { %2319 = vmatprep.mubr.msk.bf16.mxu1 %vm3040_vm1, %v3039_v2 }
 0x6a5   : > { %v1532_v54 = vpop.f32.mrb[16].mxu1 }
 0x6a6   : > { %v1533_v55 = vadd.f32 %v2178_v53, %v1532_v54  ;;  %v2301_v56 = vpop.f32.mrb[17].mxu1 }
 0x6a7   : > { %v1535_v57 = vpop.f32.mrb[18].mxu1 }
 0x6a8   : > { %v2302_v58 = vpop.f32.mrb[19].mxu1  ;;  %v1538_v59 = vadd.f32 %v1533_v55, %v3643_v4  ;;  %v2510_v4 = vld [vmem:[%s3633_s7] sm:$0xff]   ;;  %s3977_s7 = scalar_lea.vmem [#allocation17], %s3566_s21  ;;  %s1768_s21 = sld [smem:[#allocation4 + %s3014_s20]] (!%p2196_p3)  ;;  %v1769_v57 = vlaneseq (!%p2196_p3) }
 0x6a9   : > { %2312 = vmatpush3.bf16.msra.mxu1 %v2510_v4  ;;  %v2195_v45 = vld [vmem:[%s3977_s7] ss:$0 sm:$0xff] }
 0x6aa   : > { %v1539_v60 = vsel %vm970_vm2, %v1538_v59, 0.0  ;;  %2313 = vmatprep.subr.bf16.mxu1 %v3039_v2  ;;  %v1770_v58 = vshrl.u32 (!%p2196_p3), %v1769_v57, 7 }
 0x6ab   : > { %1540 = vadd.xlane.f32.xlu0 %v1539_v60 }
 0x6ad   : > { %2314 = vmatpush3.bf16.msra.mxu1 %v2511_v6 }
 0x6ae   : > { %2315 = vmatprep.subr.bf16.mxu1 %v3039_v2  ;;  %p1775_p11 = scmp.gt.s32.totalorder (!%p2196_p3), %s1768_s21, 1 }
 0x6b1   : > { %2316 = vmatpush3.bf16.msra.mxu1 %v2512_v17 }
 0x6b2   : > { %2317 = vmatprep.subr.bf16.mxu1 %v3039_v2 }
 0x6b5   : > { %2318 = vmatpush3.bf16.msra.mxu1 %v2513_v18 }
 0x738   : > { %v1541_v61 = vpop.xlane.xlu0 %1540 }
 0x739   : > { %v1543_v62 = vmul.f32 0.03125, %v1541_v61  ;;  %v2197_v61 = vld [vmem:[#allocation19] ss:$0 sm:$0xff] (!%p2196_p3) }
 0x73b   : > { %v1544_v63 = vsub.f32 %v1538_v59, %v1543_v62  ;;  %v1771_v59 = vstv (!%p2196_p3), %s1768_s21 }
 0x73c   : > { %vm1772_vm8 = vcmp.lt.s32.totalorder (!%p2196_p3), %v1770_v58, %v1771_v59 }
 0x73d   : > { %v1545_v0 = vmul.f32 %v1544_v63, %v1544_v63 }
 0x73f   : > { %v1546_v1 = vsel %vm970_vm2, %v1545_v0, 0.0 }
 0x740   : > { %1547 = vadd.xlane.f32.xlu1 %v1546_v1  ;;  %v3055_v1 = vmov (!%p2196_p3), 0.0  }
 0x741   : > { %v2199_v3 = vsel (!%p2196_p3), %vm1772_vm8, 1.0, %v3055_v1 }
 0x7cd   : > { %v1548_v7 = vpop.xlane.xlu1 %1547 }
 0x7ce   : > { %v1549_v8 = vmul.f32 0.03125, %v1548_v7 }
 0x7d0   : > { %v1550_v9 = vadd.f32 1e-05, %v1549_v8 }
 0x7d2   : > { %2530 = vrsqrt.f32 %v1550_v9 }
 0x7dc   : > { %v2531_v10 = vpop.eup %2530 }
 0x7dd   : > { %v1552_v12 = vmul.f32 %v2531_v10, %v1544_v63  ;;  %v2198_v63 = vld [vmem:[#allocation20] ss:$0 sm:$0xff] (!%p2196_p3) }
 0x7df   : > { %v1559_v14 = vmul.f32 %v2182_v11, %v1552_v12 }
 0x7e1   : > { %v1566_v15 = vadd.f32 %v2183_v13, %v1559_v14 }
 0x7e3   : > { %v1567_v16 = vpack.c.bf16 %v1566_v15, %v1566_v15 }
 0x7e5   : > { %2308 = vmatmul.mubr.msk.bf16.vlgmr.msra.gmra.mrb[20].mxu0 %vm970_vm2, %v1567_v16 }
 0x8b8   : > { %v1623_v20 = vpop.f32.mrb[20].mxu0 }
 0x8b9   : > { %v1624_v21 = vadd.f32 %v2184_v19, %v1623_v20  ;;  %v2309_v22 = vpop.f32.mrb[21].mxu0 }
 0x8ba   : > { %v1626_v23 = vpop.f32.mrb[22].mxu0 }
 0x8bb   : > { %v1629_v24 = vmax.f32 %v1624_v21, 0.0  ;;  %v2310_v25 = vpop.f32.mrb[23].mxu0 }
 0x8bd   : > { %v1630_v26 = vpack.c.bf16 %v1629_v24, %v1629_v24 }
 0x8bf   : > { %2320 = vmatmul.mubr.msk.bf16.vlgmr.msra.gmra.mrb[20].mxu1 %vm1661_vm7, %v1630_v26 }
 0x992   : > { %v1699_v28 = vpop.f32.mrb[20].mxu1 }
 0x993   : > { %v1700_v29 = vadd.f32 %v2188_v27, %v1699_v28  ;;  %v2321_v30 = vpop.f32.mrb[21].mxu1 }
 0x994   : > { %v1702_v31 = vpop.f32.mrb[22].mxu1 }
 0x995   : > { %v2322_v2 = vpop.f32.mrb[23].mxu1  ;;  %v1705_v32 = vadd.f32 %v1700_v29, %v1566_v15 }
 0x997   : > { %v1706_v33 = vsel %vm970_vm2, %v1705_v32, 0.0 }
 0x998   : > { %1707 = vadd.xlane.f32.xlu0 %v1706_v33 }
 0xa25   : > { %v1708_v34 = vpop.xlane.xlu0 %1707 }
 0xa26   : > { %v1709_v35 = vmul.f32 0.03125, %v1708_v34 }
 0xa28   : > { %v1710_v36 = vsub.f32 %v1705_v32, %v1709_v35 }
 0xa2a   : > { %v1711_v37 = vmul.f32 %v1710_v36, %v1710_v36 }
 0xa2c   : > { %v1712_v38 = vsel %vm970_vm2, %v1711_v37, 0.0 }
 0xa2d   : > { %1713 = vadd.xlane.f32.xlu0 %v1712_v38 }
 0xaba   : > { %v1714_v39 = vpop.xlane.xlu0 %1713 }
 0xabb   : > { %v1715_v40 = vmul.f32 0.03125, %v1714_v39 }
 0xabd   : > { %v1716_v41 = vadd.f32 1e-05, %v1715_v40 }
 0xabf   : > { %2532 = vrsqrt.f32 %v1716_v41 }
 0xac9   : > { %v2533_v42 = vpop.eup %2532 }
 0xaca   : > { %v1718_v44 = vmul.f32 %v2533_v42, %v1710_v36  ;;  %1737 = sbr.rel (%p2196_p3) target bundleno = 3099 (0xc1b), region = 128 }
 0xacc   : > { %v1725_v46 = vmul.f32 %v2194_v43, %v1718_v44 }
 0xace   : > { %v1732_v47 = vadd.f32 %v2195_v45, %v1725_v46 }
 0xad0   : > { %1733 = vst.msk [vmem:[#allocation2] sm:$0xff] %vm970_vm2, %v1732_v47  ;;  %v1740_v48 = vsel (!%p2196_p3), %vm970_vm2, %v1732_v47, 0.0 }
 0xad1   : > { %1741 = vadd.xlane.f32.xlu0 %v1740_v48  ;;  %s4007_s21 = smov (!%p1775_p11, %s1768_s21), 1 }
 0xad2   : > { %s1777_s12 = scvt.s32.f32 %s4007_s21 }
 0xad4   : > { %v1786_v4 = vstv %s1777_s12 }
 0xb5e   : > { %v1742_v49 = vpop.xlane.xlu0 %1741 }
 0xb5f   : > { %v1743_v50 = vmul.f32 0.03125, %v1742_v49 }
 0xb61   : > { %v1744_v51 = vsub.f32 %v1732_v47, %v1743_v50 }
 0xb63   : > { %v1745_v52 = vmul.f32 %v1744_v51, %v1744_v51 }
 0xb65   : > { %v1746_v53 = vsel %vm970_vm2, %v1745_v52, 0.0 }
 0xb66   : > { %1747 = vadd.xlane.f32.xlu0 %v1746_v53 }
 0xbf3   : > { %v1748_v54 = vpop.xlane.xlu0 %1747 }
 0xbf4   : > { %v1749_v55 = vmul.f32 0.03125, %v1748_v54 }
 0xbf6   : > { %v1750_v56 = vadd.f32 1e-05, %v1749_v55 }
 0xbf8   : > { %2534 = vrsqrt.f32 %v1750_v56 }
 0xbf9   : > { %2536 = vrcp.f32 %v1786_v4 }
 0xc02   : > { %v2535_v60 = vpop.eup %2534 }
 0xc03   : > { %v1752_v62 = vmul.f32 %v2535_v60, %v1744_v51  ;;  %v2537_v13 = vpop.eup %2536 }
 0xc05   : > { %v1759_v0 = vmul.f32 %v2197_v61, %v1752_v62 }
 0xc07   : > { %v1766_v5 = vadd.f32 %v2198_v63, %v1759_v0 }
 0xc09   : > { %1767 = vst.msk [vmem:[%s3635_s3] sm:$0xff] %vm970_vm2, %v1766_v5  ;;  %v1778_v6 = vmul.f32 %v2199_v3, %v1766_v5 }
 0xc0b   : > { %v1779_v7 = vsel %vm970_vm2, %v1778_v6, 0.0 }
 0xc0c   : > { %v1780_v8 = vrot.slane %v1779_v7, 4 }
 0xc0e   : > { %v1781_v9 = vadd.f32 %v1780_v8, %v1779_v7 }
 0xc10   : > { %v1782_v10 = vrot.slane %v1781_v9, 2 }
 0xc12   : > { %v1783_v11 = vadd.f32 %v1782_v10, %v1781_v9 }
 0xc14   : > { %v1784_v12 = vrot.slane %v1783_v11, 1 }
 0xc16   : > { %v1785_v14 = vadd.f32 %v1784_v12, %v1783_v11 }
 0xc18   : > { %v1788_v15 = vmul.f32 %v2537_v13, %v1785_v14 }
 0xc1a   : > { %1790 = vst.msk [vmem:[%s889_s17] sm:$0x1] %vm1789_vm9, %v1788_v15 }
 0xc1b PF: > { %s3979_s11 = sld [smem:[#allocation46_spill]]  ;;  %s2201_s28 = sshll.u32 %s3014_s20, 7 }
 0xc1c   : > { %s3980_s29 = sld [smem:[#allocation62_spill]]  ;;  %s1809_s4 = sshll.u32 %s3635_s3, 4  ;;  %s1810_s4 = int_to_ptr.vmem [resolvable:$true] %s1809_s4 }
 0xc1d   : > { %s1792_s26 = scalar_lea.sflag [#allocation7], %s3607_s25  ;;  %s2846_s2 = scalar_lea.vmem %s1810_s4, 128 }
 0xc1e   : > { %p2847_p8 = scmp.ne.s32.totalorder %s1810_s4, %s2846_s2  ;;  %s3056_s24 = smov [#allocation22]  }
 0xc1f   : > { %s2850_s5 = sshll.u32 %s3056_s24, 4  ;;  %s2851_s5 = int_to_ptr.vmem [resolvable:$false] %s2850_s5 }
 0xc20   : > { %s2852_s1 = scalar_lea.vmem %s2851_s5, 256  ;;  %p2853_p7 = scmp.lt.s32.totalorder %s1810_s4, %s2851_s5 }
 0xc21   : > { %p3982_p1 = scmp.ne.s32.totalorder %s3979_s11, 0  ;;  %p2854_p12 = scmp.lt.s32.totalorder %s2852_s1, %s2846_s2 }
 0xc22   : > { %s3981_s27 = smov %s3980_s29  ;;  %s3766_s0 = scalar_lea.hbm %s3980_s29, %s2201_s28 }
 0xc23   : > { %p2848_p4 = pnand %p2847_p8, %p3982_p1  ;;  %p2855_p6 = por %p2854_p12, %p2853_p7 }
 0xc25   : > { %p2849_p2 = pneg %p2848_p4 }
 0xc27   : > { %p2856_p9 = pnand %p2855_p6, %p2849_p2 }
 0xc29   : > { %2859 = shalt.err (!%p2856_p9)
}
 0xc2a   : > { %s2860_s3 = scalar_lea.hbm %s3766_s0, 128  ;;  %s2864_s6 = scalar_lea.hbm %s3981_s27, 256 }
 0xc2b   : > { %p2861_p5 = scmp.ne.s32.totalorder %s3766_s0, %s2860_s3  ;;  %p2865_p13 = scmp.lt.u32.totalorder %s3766_s0, %s3981_s27 }
 0xc2c   : > { %p2866_p3 = scmp.lt.u32.totalorder %s2864_s6, %s2860_s3  ;;  %p2868_p8 = scmp.lt.u32.totalorder %s2860_s3, %s3766_s0 }
 0xc2d   : > { %p2862_p0 = pnand %p2861_p5, %p3982_p1 }
 0xc2e   : > { %p2867_p11 = por %p2866_p3, %p2865_p13 }
 0xc2f   : > { %p2863_p10 = pneg %p2862_p0 }
 0xc30   : > { %p2869_p4 = por %p2868_p8, %p2867_p11 }
 0xc32   : > { %p2870_p2 = pnand %p2869_p4, %p2863_p10 }
 0xc34   : > { %2873 = shalt.err (!%p2870_p2)
}
 0xc35   : > { %2347 = dma.vmem_to_hbm [thread:$0]  (%p3982_p1), %s1810_s4, 128, %s3766_s0, %s1792_s26  }
 0xc36   : > { %s2202_s19 = sshll.u32 %s3014_s20, 4  ;;  %s1822_s7 = sshll.u32 %s889_s17, 4  ;;  %s1823_s7 = int_to_ptr.vmem [resolvable:$true] %s1822_s7 }
 0xc37   : > { %s3983_s12 = sld [smem:[#allocation63_spill]]  ;;  %s1797_s23 = scalar_lea.sflag [#allocation24], %s3607_s25 }
 0xc38   : > { %s2874_s8 = scalar_lea.vmem %s1823_s7, 16  ;;  %s3057_s29 = smov [#allocation23]  }
 0xc39   : > { %p2875_p7 = scmp.ne.s32.totalorder %s1823_s7, %s2874_s8  ;;  %s2878_s2 = sshll.u32 %s3057_s29, 4  ;;  %s2879_s2 = int_to_ptr.vmem [resolvable:$false] %s2878_s2 }
 0xc3a   : > { %s2880_s24 = scalar_lea.vmem %s2879_s2, 32  ;;  %p2881_p9 = scmp.lt.s32.totalorder %s1823_s7, %s2879_s2 }
 0xc3b   : > { %p2876_p12 = pnand %p2875_p7, %p3982_p1  ;;  %p2882_p5 = scmp.lt.s32.totalorder %s2880_s24, %s2874_s8 }
 0xc3d   : > { %s3793_s28 = scalar_lea.hbm %s3983_s12, %s2202_s19  ;;  %p2877_p6 = pneg %p2876_p12 }
 0xc3e   : > { %p2883_p0 = por %p2882_p5, %p2881_p9 }
 0xc40   : > { %p2884_p10 = pnand %p2883_p0, %p2877_p6 }
 0xc42   : > { %2887 = shalt.err (!%p2884_p10)
}
 0xc43   : > { %s2888_s20 = scalar_lea.hbm %s3793_s28, 16  ;;  %s2892_s0 = scalar_lea.hbm %s3983_s12, 32 }
 0xc44   : > { %p2889_p13 = scmp.ne.s32.totalorder %s3793_s28, %s2888_s20  ;;  %p2893_p8 = scmp.lt.u32.totalorder %s3793_s28, %s3983_s12 }
 0xc45   : > { %p2894_p4 = scmp.lt.u32.totalorder %s2892_s0, %s2888_s20  ;;  %p2896_p7 = scmp.lt.u32.totalorder %s2888_s20, %s3793_s28 }
 0xc46   : > { %p2890_p3 = pnand %p2889_p13, %p3982_p1 }
 0xc47   : > { %p2895_p2 = por %p2894_p4, %p2893_p8 }
 0xc48   : > { %p2891_p11 = pneg %p2890_p3 }
 0xc49   : > { %p2897_p12 = por %p2896_p7, %p2895_p2 }
 0xc4b   : > { %p2898_p6 = pnand %p2897_p12, %p2891_p11 }
 0xc4d   : > { %2901 = shalt.err (!%p2898_p6)
}
 0xc4e   : > { %2348 = dma.vmem_to_hbm [thread:$0]  (%p3982_p1), %s1823_s7, 16, %s3793_s28, %s1797_s23  }
 0xc4f PF: > { %s3984_s5 = sld [smem:[#allocation41_spill]]  ;;  %s3985_s1 = sld [smem:[#allocation35_spill]] }
 0xc50   : > { %s3986_s3 = sld [smem:[#allocation47_spill]] }
 0xc55   : > { %p2395_p9 = scmp.ge.s32.totalorder %s3984_s5, 2  ;;  %s1834_s16 = sand.u32 1, %s3985_s1  }
 0xc56   : > { %p3987_p5 = scmp.ne.s32.totalorder %s3986_s3, 0  ;;  %s1835_s30 = scalar_lea.sflag [#allocation7], %s1834_s16 }
 0xc58   : > { %p2384_p0 = pnand %p2395_p9, %p3987_p5 }
 0xc5a   : > { %2977 = dma.done.wait (!%p2384_p0), %s1835_s30, 128  }
 0xc5b   : > { %2979 = vsyncadd (!%p2384_p0), %s1835_s30, 4294967168  ;;  %s1844_s6 = scalar_lea.sflag [#allocation24], %s1834_s16 }
 0xc5c   : > { %2981 = dma.done.wait (!%p2384_p0), %s1844_s6, 16  }
 0xc5d   : > { %2983 = vsyncadd (!%p2384_p0), %s1844_s6, 4294967280  ;;  %s56_s23 = sadd.s32 1, %s3984_s5   ;;  %s3988_s11 = sld [smem:[#allocation36_spill]] }
 0xc5e   : > { %p53_p10 = scmp.ge.s32.totalorder %s56_s23, 6   ;;  %s3989_s0 = sld [smem:[#allocation45_spill]] }
 0xc5f   : > { %s3990_s14 = sld [smem:[#allocation37_spill]]  ;;  %s3991_s19 = sld [smem:[#allocation44_spill]] }
 0xc60   : > { %s3992_s1 = sld [smem:[#allocation39_spill]]  ;;  %s3993_s20 = sld [smem:[#allocation40_spill]] }
 0xc61   : > { %s3994_s21 = sld [smem:[#allocation42_spill]]  ;;  %s3995_s22 = sld [smem:[#allocation43_spill]] }
 0xc62   : > { %s3996_s29 = smov %s2990_s10  ;;  %s3998_s30 = smov %s3002_s18 }
 0xc63   : > { %s3997_s10 = smov %s3988_s11  ;;  %55 = sbr.rel (!%p53_p10) target bundleno = 47 (0x2f), region = 258 }
 0xc65   : > { %s3999_s18 = smov %s3990_s14 }
 0xc6a   :  { %1848 = vsyncpa [#allocation6], 1 }
 0xc6b   :  { %1850 = vsyncpa [#allocation6 + $0x1], 1 }
 0xc6c   :  { %1851 = vsyncpa [#allocation9], 1 }
 0xc6d   :  { %1853 = vsyncpa [#allocation9 + $0x1], 1 }
 0xc6e   :  { %1854 = vsyncpa [#allocation12], 1 }
 0xc6f   :  { %1856 = vsyncpa [#allocation12 + $0x1], 1 }
 0xc70   :  { %1857 = vsyncpa [#allocation15], 1 }
 0xc71   :  { %1859 = vsyncpa [#allocation15 + $0x1], 1 }
 0xc72   :  { %1860 = vsyncpa [#allocation18], 1 }
 0xc73   :  { %1862 = vsyncpa [#allocation18 + $0x1], 1 }
 0xc74   :  { %1863 = vsyncpa [#allocation21], 1 }
 0xc75   :  { %1864 = vsyncpa [#allocation7], 1 }
 0xc76   :  { %1866 = vsyncpa [#allocation7 + $0x1], 1 }
 0xc77   :  { %1867 = vsyncpa [#allocation24], 1 }
 0xc78   :  { %1869 = vsyncpa [#allocation24 + $0x1], 1 }

</bundles_post_ra>
